<compile_context>
chip_gen: v7x
topology: tpu7x:2x2x1
jax: 0.10.0
libtpu: 0.0.40
codegen_flags: <defaults>
</compile_context>

<pallas_src>
import functools
import math

import jax
import jax.numpy as jnp
from jax.experimental import pallas as pl
from jax.experimental.pallas import tpu as pltpu


# ----------------------------- helpers --------------------------------------

def _layernorm(h, g, be, eps):
    mu = jnp.mean(h, axis=-1, keepdims=True)
    var = jnp.mean(jnp.square(h - mu), axis=-1, keepdims=True)
    return (h - mu) * jax.lax.rsqrt(var + eps) * g + be


# -------------------- fused transformer-encoder kernel ----------------------

def _transformer_kernel(x_ref,
                        wq_ref, bq_ref, wk_ref, bk_ref, wv_ref, bv_ref,
                        wo_ref, bo_ref, g1_ref, be1_ref,
                        w1_ref, b1_ref, w2_ref, b2_ref, g2_ref, be2_ref,
                        o_ref, *, H, eps):
    """One grid step == one encoder layer.  o_ref is the resident carry."""
    S, Nb, E = x_ref.shape
    d = E // H
    scale = 1.0 / math.sqrt(d)

    # layer 0: seed the resident carry with the input tokens
    @pl.when(pl.program_id(0) == 0)
    def _():
        o_ref[...] = x_ref[...]

    # per-layer weights (leading stacked layer axis already selected by the
    # BlockSpec index_map; [0] just drops the size-1 block dim)
    wq, bq = wq_ref[0], bq_ref[0]
    wk, bk = wk_ref[0], bk_ref[0]
    wv, bv = wv_ref[0], bv_ref[0]
    wo, bo = wo_ref[0], bo_ref[0]
    g1, be1 = g1_ref[0], be1_ref[0]
    w1, b1 = w1_ref[0], b1_ref[0]
    w2, b2 = w2_ref[0], b2_ref[0]
    g2, be2 = g2_ref[0], be2_ref[0]

    # Block-diagonal head-segment matrices (built from iota, no data movement):
    #   R  (E, H): R[c, h]  = 1 iff feature column c belongs to head h
    #   RT (H, E): transpose of R, built directly (avoids an XLU transpose)
    c_r = jax.lax.broadcasted_iota(jnp.int32, (E, H), 0)
    h_r = jax.lax.broadcasted_iota(jnp.int32, (E, H), 1)
    R = ((c_r >= h_r * d) & (c_r < (h_r + 1) * d)).astype(jnp.float32)
    h_t = jax.lax.broadcasted_iota(jnp.int32, (H, E), 0)
    c_t = jax.lax.broadcasted_iota(jnp.int32, (H, E), 1)
    RT = ((c_t >= h_t * d) & (c_t < (h_t + 1) * d)).astype(jnp.float32)

    # Load every (Nb, E) seq-position slab of the carry BEFORE any writes.
    xs = [o_ref[s] for s in range(S)]
    qs = [(jnp.dot(x, wq, preferred_element_type=jnp.float32) + bq) * scale
          for x in xs]
    ks = [jnp.dot(x, wk, preferred_element_type=jnp.float32) + bk for x in xs]
    vs = [jnp.dot(x, wv, preferred_element_type=jnp.float32) + bv for x in xs]

    for s in range(S):
        # per-head scores q[s]·k[s'] for every key position s'  -> (Nb, H)
        scores = [jnp.dot(qs[s] * ks[sp], R, preferred_element_type=jnp.float32)
                  for sp in range(S)]
        m = scores[0]
        for sc in scores[1:]:
            m = jnp.maximum(m, sc)
        e = [jnp.exp(sc - m) for sc in scores]
        denom = e[0]
        for t in e[1:]:
            denom = denom + t
        inv = pl.reciprocal(denom, approx=True)          # EUP slot, ~free

        # attention output, head-major feature layout (same as torch MHA)
        attn = jnp.zeros_like(vs[0])
        for sp in range(S):
            p_full = jnp.dot(e[sp] * inv, RT,
                             preferred_element_type=jnp.float32)   # (Nb, E)
            attn = attn + p_full * vs[sp]

        # out-proj + residual + LayerNorm, then FFN + residual + LayerNorm
        h = xs[s] + jnp.dot(attn, wo, preferred_element_type=jnp.float32) + bo
        h = _layernorm(h, g1, be1, eps)
        f = jnp.maximum(
            jnp.dot(h, w1, preferred_element_type=jnp.float32) + b1, 0.0)
        f = jnp.dot(f, w2, preferred_element_type=jnp.float32) + b2
        h = _layernorm(h + f, g2, be2, eps)
        o_ref[s] = h.astype(o_ref.dtype)


def _resident_spec(shape):
    n = len(shape)
    return pl.BlockSpec(tuple(shape), lambda l: (0,) * n)


def _per_layer_spec(shape):
    n = len(shape)
    return pl.BlockSpec((1,) + tuple(shape), lambda l: (l,) + (0,) * n)


def transformer(tokens, params, num_heads, eps=1e-5):
    """tokens: (S, Nb, E), S = attended-over axis.  Runs ALL layers in one call."""
    S, Nb, E = tokens.shape
    L = params["wq"].shape[0]
    F = params["w1"].shape[-1]
    kern = functools.partial(_transformer_kernel, H=num_heads, eps=eps)
    w = _per_layer_spec
    in_specs = [
        _resident_spec((S, Nb, E)),
        w((E, E)), w((1, E)),      # wq, bq
        w((E, E)), w((1, E)),      # wk, bk
        w((E, E)), w((1, E)),      # wv, bv
        w((E, E)), w((1, E)),      # wo, bo
        w((1, E)), w((1, E)),      # g1, be1
        w((E, F)), w((1, F)),      # w1, b1
        w((F, E)), w((1, E)),      # w2, b2
        w((1, E)), w((1, E)),      # g2, be2
    ]
    return pl.pallas_call(
        kern,
        out_shape=jax.ShapeDtypeStruct((S, Nb, E), tokens.dtype),
        grid=(L,),
        in_specs=in_specs,
        out_specs=_resident_spec((S, Nb, E)),
        compiler_params=pltpu.CompilerParams(
            dimension_semantics=("arbitrary",)),
    )(tokens,
      params["wq"], params["bq"], params["wk"], params["bk"],
      params["wv"], params["bv"], params["wo"], params["bo"],
      params["g1"], params["be1"], params["w1"], params["b1"],
      params["w2"], params["b2"], params["g2"], params["be2"])


# -------------------------- fused output heads -------------------------------

def _linear_kernel(x_ref, w_ref, b_ref, o_ref):
    o_ref[...] = (jnp.dot(x_ref[...], w_ref[...],
                          preferred_element_type=jnp.float32)
                  + b_ref[...]).astype(o_ref.dtype)


def fused_heads(x, w, b):
    """x: (M, E), w: (E, D), b: (D,) -> (M, D).  All heads in ONE launch."""
    M, E = x.shape
    D = w.shape[1]
    return pl.pallas_call(
        _linear_kernel,
        out_shape=jax.ShapeDtypeStruct((M, D), x.dtype),
        grid=(1,),
        in_specs=[pl.BlockSpec((M, E), lambda i: (0, 0)),
                  pl.BlockSpec((E, D), lambda i: (0, 0)),
                  pl.BlockSpec((1, D), lambda i: (0, 0))],
        out_specs=pl.BlockSpec((M, D), lambda i: (0, 0)),
    )(x, w, b.reshape(1, D))


# ------------------------------ model glue -----------------------------------

def build_tokens(params, state, actions, actions_dict):
    B, N, E = state.shape
    names = sorted(actions_dict.keys())
    A = len(names)
    action_tokens = jnp.broadcast_to(params["action_embeddings"], (B, A, E))
    if actions is not None:
        # actions_to_vec: one-hot -> Linear  ==  W[:, idx] + b (trace-time glue)
        rows = []
        for b in range(B):
            per_b = []
            for name in sorted(actions[b].keys()):
                wt, bb = params["enc"][name]          # wt: (val_dim, E)
                per_b.append(wt[actions[b][name]] + bb)
            rows.append(jnp.stack(per_b))
        action_tokens = action_tokens + jnp.stack(rows)
    value_tokens = jnp.broadcast_to(params["value_embedding"], (B, 1, E))
    return jnp.concatenate([state, action_tokens, value_tokens], axis=1)  # (B,T,E)


def world_model_forward(params, state, actions, num_heads, actions_dict):
    B, N, E = state.shape
    names = sorted(actions_dict.keys())
    A = len(names)
    tokens = build_tokens(params, state, actions, actions_dict)     # (B, T, E)
    # batch_first=False semantics: attention mixes over dim 0 (== B).
    y = transformer(tokens, params, num_heads)                      # (B, T, E)
    vision_tokens = y[:, :N]
    tail = y[:, N:].reshape(B * (A + 1), E)        # action tokens + value token
    wcat, bcat = params["heads_cat"]
    out = fused_heads(tail, wcat, bcat).reshape(B, A + 1, wcat.shape[1])
    out_actions = {}
    off = 0
    for i, name in enumerate(names):
        dim = actions_dict[name]
        out_actions[name] = out[:, i, off:off + dim]
        off += dim
    value = out[:, A, off:off + 1]                                  # (B, 1)
    return vision_tokens, out_actions, value


# --------------------------- pure-JAX reference ------------------------------

def _ref_ln(h, g, be, eps=1e-5):
    mu = jnp.mean(h, axis=-1, keepdims=True)
    var = jnp.mean(jnp.square(h - mu), axis=-1, keepdims=True)
    return (h - mu) * jax.lax.rsqrt(var + eps) * g + be


def _ref_layer(x, p, l, H):
    S, Nb, E = x.shape
    d = E // H
    x2 = x.reshape(S * Nb, E)
    q = x2 @ p["wq"][l] + p["bq"][l, 0]
    k = x2 @ p["wk"][l] + p["bk"][l, 0]
    v = x2 @ p["wv"][l] + p["bv"][l, 0]

    def th(t):
        return t.reshape(S, Nb, H, d).transpose(1, 2, 0, 3)   # (Nb, H, S, d)

    qh, kh, vh = th(q), th(k), th(v)
    s = jnp.einsum("bhsd,bhtd->bhst", qh, kh) / math.sqrt(d)
    pa = jax.nn.softmax(s, axis=-1)
    oh = jnp.einsum("bhst,bhtd->bhsd", pa, vh)
    attn = oh.transpose(2, 0, 1, 3).reshape(S * Nb, E)
    h = _ref_ln(x2 + attn @ p["wo"][l] + p["bo"][l, 0], p["g1"][l, 0], p["be1"][l, 0])
    f = jnp.maximum(h @ p["w1"][l] + p["b1"][l, 0], 0.0) @ p["w2"][l] + p["b2"][l, 0]
    return _ref_ln(h + f, p["g2"][l, 0], p["be2"][l, 0]).reshape(S, Nb, E)


def reference_forward(params, state, actions, num_heads, actions_dict):
    B, N, E = state.shape
    x = build_tokens(params, state, actions, actions_dict)
    for l in range(params["wq"].shape[0]):
        x = _ref_layer(x, params, l, num_heads)
    vision = x[:, :N]
    act_toks = x[:, N:-1]
    val_tok = x[:, -1]
    out_actions = {}
    for i, name in enumerate(sorted(actions_dict.keys())):
        wt, bb = params["heads"][name]
        out_actions[name] = act_toks[:, i] @ wt + bb
    vw, vb = params["value_head"]
    return vision, out_actions, val_tok @ vw + vb


# ------------------------------ params init ----------------------------------

def init_params(key, hidden_dim, num_heads, num_layers, actions_dict):
    E = hidden_dim
    F = 4 * E
    L = num_layers
    names = sorted(actions_dict.keys())
    keys = iter(jax.random.split(key, 64))

    def nrm(shape, scale=0.05):
        return scale * jax.random.normal(next(keys), shape, dtype=jnp.float32)

    params = {
        "action_embeddings": jax.random.uniform(next(keys), (len(names), E),
                                                dtype=jnp.float32),
        "value_embedding": jax.random.uniform(next(keys), (1, E),
                                              dtype=jnp.float32),
        # transformer layers, stacked along a leading layer axis
        "wq": nrm((L, E, E)), "bq": nrm((L, 1, E)),
        "wk": nrm((L, E, E)), "bk": nrm((L, 1, E)),
        "wv": nrm((L, E, E)), "bv": nrm((L, 1, E)),
        "wo": nrm((L, E, E)), "bo": nrm((L, 1, E)),
        "g1": jnp.ones((L, 1, E), jnp.float32),
        "be1": jnp.zeros((L, 1, E), jnp.float32),
        "w1": nrm((L, E, F)), "b1": nrm((L, 1, F)),
        "w2": nrm((L, F, E)), "b2": nrm((L, 1, E)),
        "g2": jnp.ones((L, 1, E), jnp.float32),
        "be2": jnp.zeros((L, 1, E), jnp.float32),
    }
    params["enc"] = {n: (nrm((actions_dict[n], E)), nrm((E,))) for n in names}
    params["heads"] = {n: (nrm((E, actions_dict[n])), nrm((actions_dict[n],)))
                       for n in names}
    params["value_head"] = (nrm((E, 1)), nrm((1,)))
    # all output heads (+ value head) fused into one lane-contiguous weight
    wcat = jnp.concatenate([params["heads"][n][0] for n in names]
                           + [params["value_head"][0]], axis=1)
    bcat = jnp.concatenate([params["heads"][n][1] for n in names]
                           + [params["value_head"][1]], axis=0)
    params["heads_cat"] = (wcat, bcat)
    return params


# --------------------------------- main ---------------------------------------

if __name__ == "__main__":
    hidden_dim, num_heads, num_layers = 32, 4, 2
    actions_dict = {"move": 4, "turn": 3}
    B, N = 2, 8

    key = jax.random.PRNGKey(0)
    pkey, skey = jax.random.split(key)
    params = init_params(pkey, hidden_dim, num_heads, num_layers, actions_dict)
    state = jax.random.normal(skey, (B, N, hidden_dim), dtype=jnp.float32)
    actions = [{"move": 1, "turn": 2}, {"move": 3, "turn": 0}]

    vision, act_out, value = world_model_forward(params, state, actions,
                                                 num_heads, actions_dict)
    jax.block_until_ready(vision)
    jax.block_until_ready(value)
    for v in act_out.values():
        jax.block_until_ready(v)

    # correctness check against a pure-JAX reference of the same math
    rv, ra, rval = reference_forward(params, state, actions, num_heads,
                                     actions_dict)
    tol = dict(atol=5e-3, rtol=5e-3)   # approx reciprocal + MXU rounding headroom
    assert vision.shape == (B, N, hidden_dim) and value.shape == (B, 1)
    assert jnp.allclose(vision, rv, **tol)
    assert jnp.allclose(value, rval, **tol)
    for name in ra:
        assert act_out[name].shape == (B, actions_dict[name])
        assert jnp.allclose(act_out[name], ra[name], **tol)

    print("KERNEL_OK")
</pallas_src>

<mosaic_0001>
module attributes {stable_mosaic.version = 11 : i64} {
  func.func @_transformer_kernel(%arg0: i32, %arg1: memref<2x11x32xf32, #tpu.memory_space<vmem>>, %arg2: memref<1x32x32xf32, #tpu.memory_space<vmem>>, %arg3: memref<1x1x32xf32, #tpu.memory_space<vmem>>, %arg4: memref<1x32x32xf32, #tpu.memory_space<vmem>>, %arg5: memref<1x1x32xf32, #tpu.memory_space<vmem>>, %arg6: memref<1x32x32xf32, #tpu.memory_space<vmem>>, %arg7: memref<1x1x32xf32, #tpu.memory_space<vmem>>, %arg8: memref<1x32x32xf32, #tpu.memory_space<vmem>>, %arg9: memref<1x1x32xf32, #tpu.memory_space<vmem>>, %arg10: memref<1x1x32xf32, #tpu.memory_space<vmem>>, %arg11: memref<1x1x32xf32, #tpu.memory_space<vmem>>, %arg12: memref<1x32x128xf32, #tpu.memory_space<vmem>>, %arg13: memref<1x1x128xf32, #tpu.memory_space<vmem>>, %arg14: memref<1x128x32xf32, #tpu.memory_space<vmem>>, %arg15: memref<1x1x32xf32, #tpu.memory_space<vmem>>, %arg16: memref<1x1x32xf32, #tpu.memory_space<vmem>>, %arg17: memref<1x1x32xf32, #tpu.memory_space<vmem>>, %arg18: memref<2x11x32xf32, #tpu.memory_space<vmem>>) attributes {dimension_semantics = [#tpu.dimension_semantics<arbitrary>], iteration_bounds = array<i64: 2>, scalar_prefetch = 0 : i64, scratch_operands = 0 : i64, tpu.core_type = #tpu.core_type<tc>, window_params = [{pipeline_mode = #tpu.pipeline_mode<synchronous>, transform_indices = @transform_0, window_bounds = array<i64: 2, 11, 32>}, {transform_indices = @transform_1, window_bounds = array<i64: 1, 32, 32>}, {transform_indices = @transform_2, window_bounds = array<i64: 1, 1, 32>}, {transform_indices = @transform_3, window_bounds = array<i64: 1, 32, 32>}, {transform_indices = @transform_4, window_bounds = array<i64: 1, 1, 32>}, {transform_indices = @transform_5, window_bounds = array<i64: 1, 32, 32>}, {transform_indices = @transform_6, window_bounds = array<i64: 1, 1, 32>}, {transform_indices = @transform_7, window_bounds = array<i64: 1, 32, 32>}, {transform_indices = @transform_8, window_bounds = array<i64: 1, 1, 32>}, {transform_indices = @transform_9, window_bounds = array<i64: 1, 1, 32>}, {transform_indices = @transform_10, window_bounds = array<i64: 1, 1, 32>}, {transform_indices = @transform_11, window_bounds = array<i64: 1, 32, 128>}, {transform_indices = @transform_12, window_bounds = array<i64: 1, 1, 128>}, {transform_indices = @transform_13, window_bounds = array<i64: 1, 128, 32>}, {transform_indices = @transform_14, window_bounds = array<i64: 1, 1, 32>}, {transform_indices = @transform_15, window_bounds = array<i64: 1, 1, 32>}, {transform_indices = @transform_16, window_bounds = array<i64: 1, 1, 32>}, {pipeline_mode = #tpu.pipeline_mode<synchronous>, transform_indices = @transform_17, window_bounds = array<i64: 2, 11, 32>}]} {
    %c0_i32 = arith.constant 0 : i32
    %0 = arith.cmpi eq, %arg0, %c0_i32 : i32
    %1 = arith.extui %0 : i1 to i32
    %c0_i32_0 = arith.constant 0 : i32
    %2 = arith.cmpi ne, %1, %c0_i32_0 : i32
    scf.if %2 {
      %c0_108 = arith.constant 0 : index
      %c0_109 = arith.constant 0 : index
      %c0_110 = arith.constant 0 : index
      %247 = vector.load %arg1[%c0_108, %c0_109, %c0_110] : memref<2x11x32xf32, #tpu.memory_space<vmem>>, vector<2x11x32xf32>
      %c0_111 = arith.constant 0 : index
      %c0_112 = arith.constant 0 : index
      %c0_113 = arith.constant 0 : index
      %248 = vector.load %arg18[%c0_111, %c0_112, %c0_113] : memref<2x11x32xf32, #tpu.memory_space<vmem>>, vector<2x11x32xf32>
      tpu.vector_store %arg18[%c0_111, %c0_112, %c0_113], %247 {strides = array<i32>} : memref<2x11x32xf32, #tpu.memory_space<vmem>>, vector<2x11x32xf32>,
    } else {
    }
    %c0 = arith.constant 0 : index
    %c0_1 = arith.constant 0 : index
    %c0_2 = arith.constant 0 : index
    %3 = vector.load %arg2[%c0, %c0_1, %c0_2] : memref<1x32x32xf32, #tpu.memory_space<vmem>>, vector<1x32x32xf32>
    %4 = vector.shape_cast %3 : vector<1x32x32xf32> to vector<32x32xf32>
    %c0_3 = arith.constant 0 : index
    %c0_4 = arith.constant 0 : index
    %c0_5 = arith.constant 0 : index
    %5 = vector.load %arg3[%c0_3, %c0_4, %c0_5] : memref<1x1x32xf32, #tpu.memory_space<vmem>>, vector<1x1x32xf32>
    %6 = vector.shape_cast %5 : vector<1x1x32xf32> to vector<1x32xf32>
    %c0_6 = arith.constant 0 : index
    %c0_7 = arith.constant 0 : index
    %c0_8 = arith.constant 0 : index
    %7 = vector.load %arg4[%c0_6, %c0_7, %c0_8] : memref<1x32x32xf32, #tpu.memory_space<vmem>>, vector<1x32x32xf32>
    %8 = vector.shape_cast %7 : vector<1x32x32xf32> to vector<32x32xf32>
    %c0_9 = arith.constant 0 : index
    %c0_10 = arith.constant 0 : index
    %c0_11 = arith.constant 0 : index
    %9 = vector.load %arg5[%c0_9, %c0_10, %c0_11] : memref<1x1x32xf32, #tpu.memory_space<vmem>>, vector<1x1x32xf32>
    %10 = vector.shape_cast %9 : vector<1x1x32xf32> to vector<1x32xf32>
    %c0_12 = arith.constant 0 : index
    %c0_13 = arith.constant 0 : index
    %c0_14 = arith.constant 0 : index
    %11 = vector.load %arg6[%c0_12, %c0_13, %c0_14] : memref<1x32x32xf32, #tpu.memory_space<vmem>>, vector<1x32x32xf32>
    %12 = vector.shape_cast %11 : vector<1x32x32xf32> to vector<32x32xf32>
    %c0_15 = arith.constant 0 : index
    %c0_16 = arith.constant 0 : index
    %c0_17 = arith.constant 0 : index
    %13 = vector.load %arg7[%c0_15, %c0_16, %c0_17] : memref<1x1x32xf32, #tpu.memory_space<vmem>>, vector<1x1x32xf32>
    %14 = vector.shape_cast %13 : vector<1x1x32xf32> to vector<1x32xf32>
    %c0_18 = arith.constant 0 : index
    %c0_19 = arith.constant 0 : index
    %c0_20 = arith.constant 0 : index
    %15 = vector.load %arg8[%c0_18, %c0_19, %c0_20] : memref<1x32x32xf32, #tpu.memory_space<vmem>>, vector<1x32x32xf32>
    %16 = vector.shape_cast %15 : vector<1x32x32xf32> to vector<32x32xf32>
    %c0_21 = arith.constant 0 : index
    %c0_22 = arith.constant 0 : index
    %c0_23 = arith.constant 0 : index
    %17 = vector.load %arg9[%c0_21, %c0_22, %c0_23] : memref<1x1x32xf32, #tpu.memory_space<vmem>>, vector<1x1x32xf32>
    %18 = vector.shape_cast %17 : vector<1x1x32xf32> to vector<1x32xf32>
    %c0_24 = arith.constant 0 : index
    %c0_25 = arith.constant 0 : index
    %c0_26 = arith.constant 0 : index
    %19 = vector.load %arg10[%c0_24, %c0_25, %c0_26] : memref<1x1x32xf32, #tpu.memory_space<vmem>>, vector<1x1x32xf32>
    %20 = vector.shape_cast %19 : vector<1x1x32xf32> to vector<1x32xf32>
    %c0_27 = arith.constant 0 : index
    %c0_28 = arith.constant 0 : index
    %c0_29 = arith.constant 0 : index
    %21 = vector.load %arg11[%c0_27, %c0_28, %c0_29] : memref<1x1x32xf32, #tpu.memory_space<vmem>>, vector<1x1x32xf32>
    %22 = vector.shape_cast %21 : vector<1x1x32xf32> to vector<1x32xf32>
    %c0_30 = arith.constant 0 : index
    %c0_31 = arith.constant 0 : index
    %c0_32 = arith.constant 0 : index
    %23 = vector.load %arg12[%c0_30, %c0_31, %c0_32] : memref<1x32x128xf32, #tpu.memory_space<vmem>>, vector<1x32x128xf32>
    %24 = vector.shape_cast %23 : vector<1x32x128xf32> to vector<32x128xf32>
    %c0_33 = arith.constant 0 : index
    %c0_34 = arith.constant 0 : index
    %c0_35 = arith.constant 0 : index
    %25 = vector.load %arg13[%c0_33, %c0_34, %c0_35] : memref<1x1x128xf32, #tpu.memory_space<vmem>>, vector<1x1x128xf32>
    %26 = vector.shape_cast %25 : vector<1x1x128xf32> to vector<1x128xf32>
    %c0_36 = arith.constant 0 : index
    %c0_37 = arith.constant 0 : index
    %c0_38 = arith.constant 0 : index
    %27 = vector.load %arg14[%c0_36, %c0_37, %c0_38] : memref<1x128x32xf32, #tpu.memory_space<vmem>>, vector<1x128x32xf32>
    %28 = vector.shape_cast %27 : vector<1x128x32xf32> to vector<128x32xf32>
    %c0_39 = arith.constant 0 : index
    %c0_40 = arith.constant 0 : index
    %c0_41 = arith.constant 0 : index
    %29 = vector.load %arg15[%c0_39, %c0_40, %c0_41] : memref<1x1x32xf32, #tpu.memory_space<vmem>>, vector<1x1x32xf32>
    %30 = vector.shape_cast %29 : vector<1x1x32xf32> to vector<1x32xf32>
    %c0_42 = arith.constant 0 : index
    %c0_43 = arith.constant 0 : index
    %c0_44 = arith.constant 0 : index
    %31 = vector.load %arg16[%c0_42, %c0_43, %c0_44] : memref<1x1x32xf32, #tpu.memory_space<vmem>>, vector<1x1x32xf32>
    %32 = vector.shape_cast %31 : vector<1x1x32xf32> to vector<1x32xf32>
    %c0_45 = arith.constant 0 : index
    %c0_46 = arith.constant 0 : index
    %c0_47 = arith.constant 0 : index
    %33 = vector.load %arg17[%c0_45, %c0_46, %c0_47] : memref<1x1x32xf32, #tpu.memory_space<vmem>>, vector<1x1x32xf32>
    %34 = vector.shape_cast %33 : vector<1x1x32xf32> to vector<1x32xf32>
    %35 = tpu.iota {dimensions = array<i32: 0>} : vector<32x4xi32>
    %36 = tpu.iota {dimensions = array<i32: 1>} : vector<32x4xi32>
    %c8_i32 = arith.constant 8 : i32
    %37 = vector.broadcast %c8_i32 : i32 to vector<32x4xi32>
    %38 = arith.muli %36, %37 : vector<32x4xi32>
    %39 = arith.cmpi sge, %35, %38 : vector<32x4xi32>
    %c1_i32 = arith.constant 1 : i32
    %40 = vector.broadcast %c1_i32 : i32 to vector<32x4xi32>
    %41 = arith.addi %36, %40 : vector<32x4xi32>
    %c8_i32_48 = arith.constant 8 : i32
    %42 = vector.broadcast %c8_i32_48 : i32 to vector<32x4xi32>
    %43 = arith.muli %41, %42 : vector<32x4xi32>
    %44 = arith.cmpi slt, %35, %43 : vector<32x4xi32>
    %45 = arith.andi %39, %44 : vector<32x4xi1>
    %46 = arith.extui %45 : vector<32x4xi1> to vector<32x4xi32>
    %47 = arith.sitofp %46 : vector<32x4xi32> to vector<32x4xf32>
    %48 = tpu.iota {dimensions = array<i32: 0>} : vector<4x32xi32>
    %49 = tpu.iota {dimensions = array<i32: 1>} : vector<4x32xi32>
    %c8_i32_49 = arith.constant 8 : i32
    %50 = vector.broadcast %c8_i32_49 : i32 to vector<4x32xi32>
    %51 = arith.muli %48, %50 : vector<4x32xi32>
    %52 = arith.cmpi sge, %49, %51 : vector<4x32xi32>
    %c1_i32_50 = arith.constant 1 : i32
    %53 = vector.broadcast %c1_i32_50 : i32 to vector<4x32xi32>
    %54 = arith.addi %48, %53 : vector<4x32xi32>
    %c8_i32_51 = arith.constant 8 : i32
    %55 = vector.broadcast %c8_i32_51 : i32 to vector<4x32xi32>
    %56 = arith.muli %54, %55 : vector<4x32xi32>
    %57 = arith.cmpi slt, %49, %56 : vector<4x32xi32>
    %58 = arith.andi %52, %57 : vector<4x32xi1>
    %59 = arith.extui %58 : vector<4x32xi1> to vector<4x32xi32>
    %60 = arith.sitofp %59 : vector<4x32xi32> to vector<4x32xf32>
    %c0_52 = arith.constant 0 : index
    %c0_53 = arith.constant 0 : index
    %c0_54 = arith.constant 0 : index
    %61 = vector.load %arg18[%c0_52, %c0_53, %c0_54] : memref<2x11x32xf32, #tpu.memory_space<vmem>>, vector<1x11x32xf32>
    %62 = vector.shape_cast %61 : vector<1x11x32xf32> to vector<11x32xf32>
    %c1 = arith.constant 1 : index
    %c0_55 = arith.constant 0 : index
    %c0_56 = arith.constant 0 : index
    %63 = vector.load %arg18[%c1, %c0_55, %c0_56] : memref<2x11x32xf32, #tpu.memory_space<vmem>>, vector<1x11x32xf32>
    %64 = vector.shape_cast %63 : vector<1x11x32xf32> to vector<11x32xf32>
    %cst = arith.constant dense<0.000000e+00> : vector<11x32xf32>
    %65 = tpu.matmul %62, %4, %cst {dimension_numbers = #tpu.dot_dimension_numbers<[1], [0], [0], [1], [0, 0, 1, 1], [], []>} : vector<11x32xf32>, vector<32x32xf32>, vector<11x32xf32> -> vector<11x32xf32>
    %66 = vector.broadcast %6 : vector<1x32xf32> to vector<11x32xf32>
    %67 = arith.addf %65, %66 : vector<11x32xf32>
    %cst_57 = arith.constant 0.353553385 : f32
    %68 = vector.broadcast %cst_57 : f32 to vector<11x32xf32>
    %69 = arith.mulf %67, %68 : vector<11x32xf32>
    %cst_58 = arith.constant dense<0.000000e+00> : vector<11x32xf32>
    %70 = tpu.matmul %64, %4, %cst_58 {dimension_numbers = #tpu.dot_dimension_numbers<[1], [0], [0], [1], [0, 0, 1, 1], [], []>} : vector<11x32xf32>, vector<32x32xf32>, vector<11x32xf32> -> vector<11x32xf32>
    %71 = vector.broadcast %6 : vector<1x32xf32> to vector<11x32xf32>
    %72 = arith.addf %70, %71 : vector<11x32xf32>
    %cst_59 = arith.constant 0.353553385 : f32
    %73 = vector.broadcast %cst_59 : f32 to vector<11x32xf32>
    %74 = arith.mulf %72, %73 : vector<11x32xf32>
    %cst_60 = arith.constant dense<0.000000e+00> : vector<11x32xf32>
    %75 = tpu.matmul %62, %8, %cst_60 {dimension_numbers = #tpu.dot_dimension_numbers<[1], [0], [0], [1], [0, 0, 1, 1], [], []>} : vector<11x32xf32>, vector<32x32xf32>, vector<11x32xf32> -> vector<11x32xf32>
    %76 = vector.broadcast %10 : vector<1x32xf32> to vector<11x32xf32>
    %77 = arith.addf %75, %76 : vector<11x32xf32>
    %cst_61 = arith.constant dense<0.000000e+00> : vector<11x32xf32>
    %78 = tpu.matmul %64, %8, %cst_61 {dimension_numbers = #tpu.dot_dimension_numbers<[1], [0], [0], [1], [0, 0, 1, 1], [], []>} : vector<11x32xf32>, vector<32x32xf32>, vector<11x32xf32> -> vector<11x32xf32>
    %79 = vector.broadcast %10 : vector<1x32xf32> to vector<11x32xf32>
    %80 = arith.addf %78, %79 : vector<11x32xf32>
    %cst_62 = arith.constant dense<0.000000e+00> : vector<11x32xf32>
    %81 = tpu.matmul %62, %12, %cst_62 {dimension_numbers = #tpu.dot_dimension_numbers<[1], [0], [0], [1], [0, 0, 1, 1], [], []>} : vector<11x32xf32>, vector<32x32xf32>, vector<11x32xf32> -> vector<11x32xf32>
    %82 = vector.broadcast %14 : vector<1x32xf32> to vector<11x32xf32>
    %83 = arith.addf %81, %82 : vector<11x32xf32>
    %cst_63 = arith.constant dense<0.000000e+00> : vector<11x32xf32>
    %84 = tpu.matmul %64, %12, %cst_63 {dimension_numbers = #tpu.dot_dimension_numbers<[1], [0], [0], [1], [0, 0, 1, 1], [], []>} : vector<11x32xf32>, vector<32x32xf32>, vector<11x32xf32> -> vector<11x32xf32>
    %85 = vector.broadcast %14 : vector<1x32xf32> to vector<11x32xf32>
    %86 = arith.addf %84, %85 : vector<11x32xf32>
    %87 = arith.mulf %69, %77 : vector<11x32xf32>
    %cst_64 = arith.constant dense<0.000000e+00> : vector<11x4xf32>
    %88 = tpu.matmul %87, %47, %cst_64 {dimension_numbers = #tpu.dot_dimension_numbers<[1], [0], [0], [1], [0, 0, 1, 1], [], []>} : vector<11x32xf32>, vector<32x4xf32>, vector<11x4xf32> -> vector<11x4xf32>
    %89 = arith.mulf %69, %80 : vector<11x32xf32>
    %cst_65 = arith.constant dense<0.000000e+00> : vector<11x4xf32>
    %90 = tpu.matmul %89, %47, %cst_65 {dimension_numbers = #tpu.dot_dimension_numbers<[1], [0], [0], [1], [0, 0, 1, 1], [], []>} : vector<11x32xf32>, vector<32x4xf32>, vector<11x4xf32> -> vector<11x4xf32>
    %91 = arith.maximumf %88, %90 : vector<11x4xf32>
    %92 = arith.subf %88, %91 : vector<11x4xf32>
    %93 = math.exp %92 : vector<11x4xf32>
    %94 = arith.subf %90, %91 : vector<11x4xf32>
    %95 = math.exp %94 : vector<11x4xf32>
    %96 = arith.addf %93, %95 : vector<11x4xf32>
    %97 = tpu.reciprocal %96 {approx = true} : vector<11x4xf32> -> vector<11x4xf32>
    %cst_66 = arith.constant 0.000000e+00 : f32
    %98 = vector.broadcast %cst_66 : f32 to vector<11x32xf32>
    %99 = arith.mulf %93, %97 : vector<11x4xf32>
    %cst_67 = arith.constant dense<0.000000e+00> : vector<11x32xf32>
    %100 = tpu.matmul %99, %60, %cst_67 {dimension_numbers = #tpu.dot_dimension_numbers<[1], [0], [0], [1], [0, 0, 1, 1], [], []>} : vector<11x4xf32>, vector<4x32xf32>, vector<11x32xf32> -> vector<11x32xf32>
    %101 = arith.mulf %100, %83 : vector<11x32xf32>
    %102 = arith.addf %98, %101 : vector<11x32xf32>
    %103 = arith.mulf %95, %97 : vector<11x4xf32>
    %cst_68 = arith.constant dense<0.000000e+00> : vector<11x32xf32>
    %104 = tpu.matmul %103, %60, %cst_68 {dimension_numbers = #tpu.dot_dimension_numbers<[1], [0], [0], [1], [0, 0, 1, 1], [], []>} : vector<11x4xf32>, vector<4x32xf32>, vector<11x32xf32> -> vector<11x32xf32>
    %105 = arith.mulf %104, %86 : vector<11x32xf32>
    %106 = arith.addf %102, %105 : vector<11x32xf32>
    %cst_69 = arith.constant dense<0.000000e+00> : vector<11x32xf32>
    %107 = tpu.matmul %106, %16, %cst_69 {dimension_numbers = #tpu.dot_dimension_numbers<[1], [0], [0], [1], [0, 0, 1, 1], [], []>} : vector<11x32xf32>, vector<32x32xf32>, vector<11x32xf32> -> vector<11x32xf32>
    %108 = arith.addf %62, %107 : vector<11x32xf32>
    %109 = vector.broadcast %18 : vector<1x32xf32> to vector<11x32xf32>
    %110 = arith.addf %108, %109 : vector<11x32xf32>
    %cst_70 = arith.constant dense<0.000000e+00> : vector<11xf32>
    %111 = vector.multi_reduction <add>, %110, %cst_70 [1] : vector<11x32xf32> to vector<11xf32>
    %112 = vector.shape_cast %111 : vector<11xf32> to vector<11x1xf32>
    %cst_71 = arith.constant 3.200000e+01 : f32
    %113 = vector.broadcast %cst_71 : f32 to vector<11x1xf32>
    %114 = arith.divf %112, %113 : vector<11x1xf32>
    %115 = vector.broadcast %114 : vector<11x1xf32> to vector<11x32xf32>
    %116 = arith.subf %110, %115 : vector<11x32xf32>
    %117 = arith.mulf %116, %116 : vector<11x32xf32>
    %cst_72 = arith.constant dense<0.000000e+00> : vector<11xf32>
    %118 = vector.multi_reduction <add>, %117, %cst_72 [1] : vector<11x32xf32> to vector<11xf32>
    %119 = vector.shape_cast %118 : vector<11xf32> to vector<11x1xf32>
    %cst_73 = arith.constant 3.200000e+01 : f32
    %120 = vector.broadcast %cst_73 : f32 to vector<11x1xf32>
    %121 = arith.divf %119, %120 : vector<11x1xf32>
    %122 = vector.broadcast %114 : vector<11x1xf32> to vector<11x32xf32>
    %123 = arith.subf %110, %122 : vector<11x32xf32>
    %cst_74 = arith.constant 9.99999974E-6 : f32
    %124 = vector.broadcast %cst_74 : f32 to vector<11x1xf32>
    %125 = arith.addf %121, %124 : vector<11x1xf32>
    %126 = math.rsqrt %125 : vector<11x1xf32>
    %127 = vector.broadcast %126 : vector<11x1xf32> to vector<11x32xf32>
    %128 = arith.mulf %123, %127 : vector<11x32xf32>
    %129 = vector.broadcast %20 : vector<1x32xf32> to vector<11x32xf32>
    %130 = arith.mulf %128, %129 : vector<11x32xf32>
    %131 = vector.broadcast %22 : vector<1x32xf32> to vector<11x32xf32>
    %132 = arith.addf %130, %131 : vector<11x32xf32>
    %cst_75 = arith.constant dense<0.000000e+00> : vector<11x128xf32>
    %133 = tpu.matmul %132, %24, %cst_75 {dimension_numbers = #tpu.dot_dimension_numbers<[1], [0], [0], [1], [0, 0, 1, 1], [], []>} : vector<11x32xf32>, vector<32x128xf32>, vector<11x128xf32> -> vector<11x128xf32>
    %134 = vector.broadcast %26 : vector<1x128xf32> to vector<11x128xf32>
    %135 = arith.addf %133, %134 : vector<11x128xf32>
    %cst_76 = arith.constant 0.000000e+00 : f32
    %136 = vector.broadcast %cst_76 : f32 to vector<11x128xf32>
    %137 = arith.maximumf %135, %136 : vector<11x128xf32>
    %cst_77 = arith.constant dense<0.000000e+00> : vector<11x32xf32>
    %138 = tpu.matmul %137, %28, %cst_77 {dimension_numbers = #tpu.dot_dimension_numbers<[1], [0], [0], [1], [0, 0, 1, 1], [], []>} : vector<11x128xf32>, vector<128x32xf32>, vector<11x32xf32> -> vector<11x32xf32>
    %139 = vector.broadcast %30 : vector<1x32xf32> to vector<11x32xf32>
    %140 = arith.addf %138, %139 : vector<11x32xf32>
    %141 = arith.addf %132, %140 : vector<11x32xf32>
    %cst_78 = arith.constant dense<0.000000e+00> : vector<11xf32>
    %142 = vector.multi_reduction <add>, %141, %cst_78 [1] : vector<11x32xf32> to vector<11xf32>
    %143 = vector.shape_cast %142 : vector<11xf32> to vector<11x1xf32>
    %cst_79 = arith.constant 3.200000e+01 : f32
    %144 = vector.broadcast %cst_79 : f32 to vector<11x1xf32>
    %145 = arith.divf %143, %144 : vector<11x1xf32>
    %146 = vector.broadcast %145 : vector<11x1xf32> to vector<11x32xf32>
    %147 = arith.subf %141, %146 : vector<11x32xf32>
    %148 = arith.mulf %147, %147 : vector<11x32xf32>
    %cst_80 = arith.constant dense<0.000000e+00> : vector<11xf32>
    %149 = vector.multi_reduction <add>, %148, %cst_80 [1] : vector<11x32xf32> to vector<11xf32>
    %150 = vector.shape_cast %149 : vector<11xf32> to vector<11x1xf32>
    %cst_81 = arith.constant 3.200000e+01 : f32
    %151 = vector.broadcast %cst_81 : f32 to vector<11x1xf32>
    %152 = arith.divf %150, %151 : vector<11x1xf32>
    %153 = vector.broadcast %145 : vector<11x1xf32> to vector<11x32xf32>
    %154 = arith.subf %141, %153 : vector<11x32xf32>
    %cst_82 = arith.constant 9.99999974E-6 : f32
    %155 = vector.broadcast %cst_82 : f32 to vector<11x1xf32>
    %156 = arith.addf %152, %155 : vector<11x1xf32>
    %157 = math.rsqrt %156 : vector<11x1xf32>
    %158 = vector.broadcast %157 : vector<11x1xf32> to vector<11x32xf32>
    %159 = arith.mulf %154, %158 : vector<11x32xf32>
    %160 = vector.broadcast %32 : vector<1x32xf32> to vector<11x32xf32>
    %161 = arith.mulf %159, %160 : vector<11x32xf32>
    %162 = vector.broadcast %34 : vector<1x32xf32> to vector<11x32xf32>
    %163 = arith.addf %161, %162 : vector<11x32xf32>
    %c0_83 = arith.constant 0 : index
    %c0_84 = arith.constant 0 : index
    %c0_85 = arith.constant 0 : index
    %164 = vector.load %arg18[%c0_83, %c0_84, %c0_85] : memref<2x11x32xf32, #tpu.memory_space<vmem>>, vector<1x11x32xf32>
    %165 = vector.shape_cast %164 : vector<1x11x32xf32> to vector<11x32xf32>
    %166 = vector.shape_cast %163 : vector<11x32xf32> to vector<1x11x32xf32>
    tpu.vector_store %arg18[%c0_83, %c0_84, %c0_85], %166 {strides = array<i32>} : memref<2x11x32xf32, #tpu.memory_space<vmem>>, vector<1x11x32xf32>,
    %167 = arith.mulf %74, %77 : vector<11x32xf32>
    %cst_86 = arith.constant dense<0.000000e+00> : vector<11x4xf32>
    %168 = tpu.matmul %167, %47, %cst_86 {dimension_numbers = #tpu.dot_dimension_numbers<[1], [0], [0], [1], [0, 0, 1, 1], [], []>} : vector<11x32xf32>, vector<32x4xf32>, vector<11x4xf32> -> vector<11x4xf32>
    %169 = arith.mulf %74, %80 : vector<11x32xf32>
    %cst_87 = arith.constant dense<0.000000e+00> : vector<11x4xf32>
    %170 = tpu.matmul %169, %47, %cst_87 {dimension_numbers = #tpu.dot_dimension_numbers<[1], [0], [0], [1], [0, 0, 1, 1], [], []>} : vector<11x32xf32>, vector<32x4xf32>, vector<11x4xf32> -> vector<11x4xf32>
    %171 = arith.maximumf %168, %170 : vector<11x4xf32>
    %172 = arith.subf %168, %171 : vector<11x4xf32>
    %173 = math.exp %172 : vector<11x4xf32>
    %174 = arith.subf %170, %171 : vector<11x4xf32>
    %175 = math.exp %174 : vector<11x4xf32>
    %176 = arith.addf %173, %175 : vector<11x4xf32>
    %177 = tpu.reciprocal %176 {approx = true} : vector<11x4xf32> -> vector<11x4xf32>
    %cst_88 = arith.constant 0.000000e+00 : f32
    %178 = vector.broadcast %cst_88 : f32 to vector<11x32xf32>
    %179 = arith.mulf %173, %177 : vector<11x4xf32>
    %cst_89 = arith.constant dense<0.000000e+00> : vector<11x32xf32>
    %180 = tpu.matmul %179, %60, %cst_89 {dimension_numbers = #tpu.dot_dimension_numbers<[1], [0], [0], [1], [0, 0, 1, 1], [], []>} : vector<11x4xf32>, vector<4x32xf32>, vector<11x32xf32> -> vector<11x32xf32>
    %181 = arith.mulf %180, %83 : vector<11x32xf32>
    %182 = arith.addf %178, %181 : vector<11x32xf32>
    %183 = arith.mulf %175, %177 : vector<11x4xf32>
    %cst_90 = arith.constant dense<0.000000e+00> : vector<11x32xf32>
    %184 = tpu.matmul %183, %60, %cst_90 {dimension_numbers = #tpu.dot_dimension_numbers<[1], [0], [0], [1], [0, 0, 1, 1], [], []>} : vector<11x4xf32>, vector<4x32xf32>, vector<11x32xf32> -> vector<11x32xf32>
    %185 = arith.mulf %184, %86 : vector<11x32xf32>
    %186 = arith.addf %182, %185 : vector<11x32xf32>
    %cst_91 = arith.constant dense<0.000000e+00> : vector<11x32xf32>
    %187 = tpu.matmul %186, %16, %cst_91 {dimension_numbers = #tpu.dot_dimension_numbers<[1], [0], [0], [1], [0, 0, 1, 1], [], []>} : vector<11x32xf32>, vector<32x32xf32>, vector<11x32xf32> -> vector<11x32xf32>
    %188 = arith.addf %64, %187 : vector<11x32xf32>
    %189 = vector.broadcast %18 : vector<1x32xf32> to vector<11x32xf32>
    %190 = arith.addf %188, %189 : vector<11x32xf32>
    %cst_92 = arith.constant dense<0.000000e+00> : vector<11xf32>
    %191 = vector.multi_reduction <add>, %190, %cst_92 [1] : vector<11x32xf32> to vector<11xf32>
    %192 = vector.shape_cast %191 : vector<11xf32> to vector<11x1xf32>
    %cst_93 = arith.constant 3.200000e+01 : f32
    %193 = vector.broadcast %cst_93 : f32 to vector<11x1xf32>
    %194 = arith.divf %192, %193 : vector<11x1xf32>
    %195 = vector.broadcast %194 : vector<11x1xf32> to vector<11x32xf32>
    %196 = arith.subf %190, %195 : vector<11x32xf32>
    %197 = arith.mulf %196, %196 : vector<11x32xf32>
    %cst_94 = arith.constant dense<0.000000e+00> : vector<11xf32>
    %198 = vector.multi_reduction <add>, %197, %cst_94 [1] : vector<11x32xf32> to vector<11xf32>
    %199 = vector.shape_cast %198 : vector<11xf32> to vector<11x1xf32>
    %cst_95 = arith.constant 3.200000e+01 : f32
    %200 = vector.broadcast %cst_95 : f32 to vector<11x1xf32>
    %201 = arith.divf %199, %200 : vector<11x1xf32>
    %202 = vector.broadcast %194 : vector<11x1xf32> to vector<11x32xf32>
    %203 = arith.subf %190, %202 : vector<11x32xf32>
    %cst_96 = arith.constant 9.99999974E-6 : f32
    %204 = vector.broadcast %cst_96 : f32 to vector<11x1xf32>
    %205 = arith.addf %201, %204 : vector<11x1xf32>
    %206 = math.rsqrt %205 : vector<11x1xf32>
    %207 = vector.broadcast %206 : vector<11x1xf32> to vector<11x32xf32>
    %208 = arith.mulf %203, %207 : vector<11x32xf32>
    %209 = vector.broadcast %20 : vector<1x32xf32> to vector<11x32xf32>
    %210 = arith.mulf %208, %209 : vector<11x32xf32>
    %211 = vector.broadcast %22 : vector<1x32xf32> to vector<11x32xf32>
    %212 = arith.addf %210, %211 : vector<11x32xf32>
    %cst_97 = arith.constant dense<0.000000e+00> : vector<11x128xf32>
    %213 = tpu.matmul %212, %24, %cst_97 {dimension_numbers = #tpu.dot_dimension_numbers<[1], [0], [0], [1], [0, 0, 1, 1], [], []>} : vector<11x32xf32>, vector<32x128xf32>, vector<11x128xf32> -> vector<11x128xf32>
    %214 = vector.broadcast %26 : vector<1x128xf32> to vector<11x128xf32>
    %215 = arith.addf %213, %214 : vector<11x128xf32>
    %cst_98 = arith.constant 0.000000e+00 : f32
    %216 = vector.broadcast %cst_98 : f32 to vector<11x128xf32>
    %217 = arith.maximumf %215, %216 : vector<11x128xf32>
    %cst_99 = arith.constant dense<0.000000e+00> : vector<11x32xf32>
    %218 = tpu.matmul %217, %28, %cst_99 {dimension_numbers = #tpu.dot_dimension_numbers<[1], [0], [0], [1], [0, 0, 1, 1], [], []>} : vector<11x128xf32>, vector<128x32xf32>, vector<11x32xf32> -> vector<11x32xf32>
    %219 = vector.broadcast %30 : vector<1x32xf32> to vector<11x32xf32>
    %220 = arith.addf %218, %219 : vector<11x32xf32>
    %221 = arith.addf %212, %220 : vector<11x32xf32>
    %cst_100 = arith.constant dense<0.000000e+00> : vector<11xf32>
    %222 = vector.multi_reduction <add>, %221, %cst_100 [1] : vector<11x32xf32> to vector<11xf32>
    %223 = vector.shape_cast %222 : vector<11xf32> to vector<11x1xf32>
    %cst_101 = arith.constant 3.200000e+01 : f32
    %224 = vector.broadcast %cst_101 : f32 to vector<11x1xf32>
    %225 = arith.divf %223, %224 : vector<11x1xf32>
    %226 = vector.broadcast %225 : vector<11x1xf32> to vector<11x32xf32>
    %227 = arith.subf %221, %226 : vector<11x32xf32>
    %228 = arith.mulf %227, %227 : vector<11x32xf32>
    %cst_102 = arith.constant dense<0.000000e+00> : vector<11xf32>
    %229 = vector.multi_reduction <add>, %228, %cst_102 [1] : vector<11x32xf32> to vector<11xf32>
    %230 = vector.shape_cast %229 : vector<11xf32> to vector<11x1xf32>
    %cst_103 = arith.constant 3.200000e+01 : f32
    %231 = vector.broadcast %cst_103 : f32 to vector<11x1xf32>
    %232 = arith.divf %230, %231 : vector<11x1xf32>
    %233 = vector.broadcast %225 : vector<11x1xf32> to vector<11x32xf32>
    %234 = arith.subf %221, %233 : vector<11x32xf32>
    %cst_104 = arith.constant 9.99999974E-6 : f32
    %235 = vector.broadcast %cst_104 : f32 to vector<11x1xf32>
    %236 = arith.addf %232, %235 : vector<11x1xf32>
    %237 = math.rsqrt %236 : vector<11x1xf32>
    %238 = vector.broadcast %237 : vector<11x1xf32> to vector<11x32xf32>
    %239 = arith.mulf %234, %238 : vector<11x32xf32>
    %240 = vector.broadcast %32 : vector<1x32xf32> to vector<11x32xf32>
    %241 = arith.mulf %239, %240 : vector<11x32xf32>
    %242 = vector.broadcast %34 : vector<1x32xf32> to vector<11x32xf32>
    %243 = arith.addf %241, %242 : vector<11x32xf32>
    %c1_105 = arith.constant 1 : index
    %c0_106 = arith.constant 0 : index
    %c0_107 = arith.constant 0 : index
    %244 = vector.load %arg18[%c1_105, %c0_106, %c0_107] : memref<2x11x32xf32, #tpu.memory_space<vmem>>, vector<1x11x32xf32>
    %245 = vector.shape_cast %244 : vector<1x11x32xf32> to vector<11x32xf32>
    %246 = vector.shape_cast %243 : vector<11x32xf32> to vector<1x11x32xf32>
    tpu.vector_store %arg18[%c1_105, %c0_106, %c0_107], %246 {strides = array<i32>} : memref<2x11x32xf32, #tpu.memory_space<vmem>>, vector<1x11x32xf32>,
    return
  }
  func.func @transform_0(%arg0: i32) -> (i32, i32, i32) {
    %c0_i32 = arith.constant 0 : i32
    %c0_i32_0 = arith.constant 0 : i32
    %c0_i32_1 = arith.constant 0 : i32
    %c0_i32_2 = arith.constant 0 : i32
    return %c0_i32, %c0_i32_0, %c0_i32_1 : i32, i32, i32
  }
  func.func @transform_1(%arg0: i32) -> (i32, i32, i32) {
    %c0_i32 = arith.constant 0 : i32
    %c0_i32_0 = arith.constant 0 : i32
    %c0_i32_1 = arith.constant 0 : i32
    return %arg0, %c0_i32, %c0_i32_0 : i32, i32, i32
  }
  func.func @transform_2(%arg0: i32) -> (i32, i32, i32) {
    %c0_i32 = arith.constant 0 : i32
    %c0_i32_0 = arith.constant 0 : i32
    %c0_i32_1 = arith.constant 0 : i32
    return %arg0, %c0_i32, %c0_i32_0 : i32, i32, i32
  }
  func.func @transform_3(%arg0: i32) -> (i32, i32, i32) {
    %c0_i32 = arith.constant 0 : i32
    %c0_i32_0 = arith.constant 0 : i32
    %c0_i32_1 = arith.constant 0 : i32
    return %arg0, %c0_i32, %c0_i32_0 : i32, i32, i32
  }
  func.func @transform_4(%arg0: i32) -> (i32, i32, i32) {
    %c0_i32 = arith.constant 0 : i32
    %c0_i32_0 = arith.constant 0 : i32
    %c0_i32_1 = arith.constant 0 : i32
    return %arg0, %c0_i32, %c0_i32_0 : i32, i32, i32
  }
  func.func @transform_5(%arg0: i32) -> (i32, i32, i32) {
    %c0_i32 = arith.constant 0 : i32
    %c0_i32_0 = arith.constant 0 : i32
    %c0_i32_1 = arith.constant 0 : i32
    return %arg0, %c0_i32, %c0_i32_0 : i32, i32, i32
  }
  func.func @transform_6(%arg0: i32) -> (i32, i32, i32) {
    %c0_i32 = arith.constant 0 : i32
    %c0_i32_0 = arith.constant 0 : i32
    %c0_i32_1 = arith.constant 0 : i32
    return %arg0, %c0_i32, %c0_i32_0 : i32, i32, i32
  }
  func.func @transform_7(%arg0: i32) -> (i32, i32, i32) {
    %c0_i32 = arith.constant 0 : i32
    %c0_i32_0 = arith.constant 0 : i32
    %c0_i32_1 = arith.constant 0 : i32
    return %arg0, %c0_i32, %c0_i32_0 : i32, i32, i32
  }
  func.func @transform_8(%arg0: i32) -> (i32, i32, i32) {
    %c0_i32 = arith.constant 0 : i32
    %c0_i32_0 = arith.constant 0 : i32
    %c0_i32_1 = arith.constant 0 : i32
    return %arg0, %c0_i32, %c0_i32_0 : i32, i32, i32
  }
  func.func @transform_9(%arg0: i32) -> (i32, i32, i32) {
    %c0_i32 = arith.constant 0 : i32
    %c0_i32_0 = arith.constant 0 : i32
    %c0_i32_1 = arith.constant 0 : i32
    return %arg0, %c0_i32, %c0_i32_0 : i32, i32, i32
  }
  func.func @transform_10(%arg0: i32) -> (i32, i32, i32) {
    %c0_i32 = arith.constant 0 : i32
    %c0_i32_0 = arith.constant 0 : i32
    %c0_i32_1 = arith.constant 0 : i32
    return %arg0, %c0_i32, %c0_i32_0 : i32, i32, i32
  }
  func.func @transform_11(%arg0: i32) -> (i32, i32, i32) {
    %c0_i32 = arith.constant 0 : i32
    %c0_i32_0 = arith.constant 0 : i32
    %c0_i32_1 = arith.constant 0 : i32
    return %arg0, %c0_i32, %c0_i32_0 : i32, i32, i32
  }
  func.func @transform_12(%arg0: i32) -> (i32, i32, i32) {
    %c0_i32 = arith.constant 0 : i32
    %c0_i32_0 = arith.constant 0 : i32
    %c0_i32_1 = arith.constant 0 : i32
    return %arg0, %c0_i32, %c0_i32_0 : i32, i32, i32
  }
  func.func @transform_13(%arg0: i32) -> (i32, i32, i32) {
    %c0_i32 = arith.constant 0 : i32
    %c0_i32_0 = arith.constant 0 : i32
    %c0_i32_1 = arith.constant 0 : i32
    return %arg0, %c0_i32, %c0_i32_0 : i32, i32, i32
  }
  func.func @transform_14(%arg0: i32) -> (i32, i32, i32) {
    %c0_i32 = arith.constant 0 : i32
    %c0_i32_0 = arith.constant 0 : i32
    %c0_i32_1 = arith.constant 0 : i32
    return %arg0, %c0_i32, %c0_i32_0 : i32, i32, i32
  }
  func.func @transform_15(%arg0: i32) -> (i32, i32, i32) {
    %c0_i32 = arith.constant 0 : i32
    %c0_i32_0 = arith.constant 0 : i32
    %c0_i32_1 = arith.constant 0 : i32
    return %arg0, %c0_i32, %c0_i32_0 : i32, i32, i32
  }
  func.func @transform_16(%arg0: i32) -> (i32, i32, i32) {
    %c0_i32 = arith.constant 0 : i32
    %c0_i32_0 = arith.constant 0 : i32
    %c0_i32_1 = arith.constant 0 : i32
    return %arg0, %c0_i32, %c0_i32_0 : i32, i32, i32
  }
  func.func @transform_17(%arg0: i32) -> (i32, i32, i32) {
    %c0_i32 = arith.constant 0 : i32
    %c0_i32_0 = arith.constant 0 : i32
    %c0_i32_1 = arith.constant 0 : i32
    %c0_i32_2 = arith.constant 0 : i32
    return %c0_i32, %c0_i32_0, %c0_i32_1 : i32, i32, i32
  }
}

</mosaic_0001>

<bundles_post_ra>
// kernel: tpu_custom_call.1
= control target key start
LH: loop header
LB: loop body
LE: loop exit
PB: predicated region body
PF: predicated region fallthrough
CT: control target
= control target key end

     0   :  { %s3721_s24 = smov 0   ;;  %s4263_s0 = inlined_call_operand.vmem [shape: f32[2,11,32], index: 0, kind: input, shape index: {}]   ;;  %s4264_s1 = inlined_call_operand.vmem [shape: f32[2,32,32], index: 1, kind: input, shape index: {}]   ;;  %s4265_s2 = inlined_call_operand.vmem [shape: f32[2,1,32], index: 2, kind: input, shape index: {}]   ;;  %s4266_s3 = inlined_call_operand.vmem [shape: f32[2,32,32], index: 3, kind: input, shape index: {}]   ;;  %s4267_s4 = inlined_call_operand.vmem [shape: f32[2,1,32], index: 4, kind: input, shape index: {}]   ;;  %s4268_s5 = inlined_call_operand.vmem [shape: f32[2,32,32], index: 5, kind: input, shape index: {}]   ;;  %s4269_s6 = inlined_call_operand.vmem [shape: f32[2,1,32], index: 6, kind: input, shape index: {}]   ;;  %s4270_s7 = inlined_call_operand.vmem [shape: f32[2,32,32], index: 7, kind: input, shape index: {}]   ;;  %s4271_s8 = inlined_call_operand.vmem [shape: f32[2,1,32], index: 8, kind: input, shape index: {}]   ;;  %s4272_s9 = inlined_call_operand.vmem [shape: f32[2,1,32], index: 9, kind: input, shape index: {}]   ;;  %s4273_s10 = inlined_call_operand.vmem [shape: f32[2,1,32], index: 10, kind: input, shape index: {}]   ;;  %s4274_s11 = inlined_call_operand.vmem [shape: f32[2,32,128], index: 11, kind: input, shape index: {}]   ;;  %s4275_s12 = inlined_call_operand.vmem [shape: f32[2,1,128], index: 12, kind: input, shape index: {}]   ;;  %s4276_s13 = inlined_call_operand.vmem [shape: f32[2,128,32], index: 13, kind: input, shape index: {}]   ;;  %s4277_s14 = inlined_call_operand.vmem [shape: f32[2,1,32], index: 14, kind: input, shape index: {}]   ;;  %s4278_s15 = inlined_call_operand.vmem [shape: f32[2,1,32], index: 15, kind: input, shape index: {}]   ;;  %s4279_s16 = inlined_call_operand.vmem [shape: f32[2,1,32], index: 16, kind: input, shape index: {}]   ;;  %s4280_s17 = inlined_call_operand.vmem [shape: f32[2,11,32], index: 17, kind: output, shape index: {}]  }
   0x1   :  { %4285 = sst [smem:[#allocation3_spill]] %s4263_s0 }
   0x2   :  { %4286 = sst [smem:[#allocation4_spill]] %s4264_s1 }
   0x3   :  { %4287 = sst [smem:[#allocation5_spill]] %s4265_s2 }
   0x4   :  { %4288 = sst [smem:[#allocation6_spill]] %s4266_s3 }
   0x5   :  { %4289 = sst [smem:[#allocation7_spill]] %s4267_s4 }
   0x6   :  { %4290 = sst [smem:[#allocation8_spill]] %s4268_s5 }
   0x7   :  { %4291 = sst [smem:[#allocation9_spill]] %s4270_s7 }
   0x8   :  { %4292 = sst [smem:[#allocation10_spill]] %s4273_s10 }
   0x9   :  { %4293 = sst [smem:[#allocation11_spill]] %s4274_s11 }
   0xa   :  { %4294 = sst [smem:[#allocation12_spill]] %s4278_s15 }
   0xb   :  { %4295 = sst [smem:[#allocation13_spill]] %s4279_s16 }
   0xc   :  { %4296 = sst [smem:[#allocation14_spill]] %s4280_s17 }
   0xd LB: > { %4297 = sst [smem:[#allocation2_spill]] %s3627_s24  ;;  %s2919_s25 = sadd.s32 4294967295, %s3627_s24   ;;  %s3627_s24 = sphi %s3721_s24, %s27_s24  }
   0xe   : > { %p2922_p0 = scmp.ge.s32.totalorder %s3627_s24, 1  ;;  %p612_p1 = scmp.lt.s32.totalorder %s3627_s24, 3 }
  0x10   : > { %p613_p2 = pnand %p2922_p0, %p612_p1 }
  0x11   : > { %p714_p3 = scmp.lt.s32.totalorder (!%p613_p2), %s2919_s25, 1  ;;  %s4299_s19 = sld [smem:[#allocation4_spill]] (!%p613_p2) }
  0x12   : > { %616 = sbr.rel (%p613_p2) target bundleno = 3054 (0xbee), region = 88  ;;  %s4300_s3 = sld [smem:[#allocation6_spill]] (!%p613_p2) }
  0x13   : > { %s4302_s5 = sld [smem:[#allocation8_spill]] (!%p613_p2)  ;;  %s4303_s7 = sld [smem:[#allocation9_spill]] (!%p613_p2) }
  0x14   : > { %s4305_s11 = sld [smem:[#allocation11_spill]] (!%p613_p2)  ;;  %s4306_s17 = sld [smem:[#allocation12_spill]] (!%p613_p2) }
  0x15   : > { %p2935_p4 = scmp.ne.s32.totalorder (!%p613_p2), %s2919_s25, 0 }
  0x19   : > { %s3729_s26 = scalar_select %p714_p3, %s2919_s25, 1 }
  0x1a   : > { %s4308_s30 = sld [smem:[#allocation3_spill]] (!%p2935_p4)  ;;  %vm782_vm0 = vcmask (!%p2935_p4), 261120   ;;  %vm784_vm1 = vcmask (!%p2935_p4), 256000   ;;  %s4309_s23 = sld [smem:[#allocation14_spill]] (!%p2935_p4) }
  0x1b   : > { %s3013_s27 = sshll.u32 %s3729_s26, 5  ;;  %s767_s15 = scalar_lea.vmem %s4277_s14, %s3729_s26 }
  0x1c   : > { %s3739_s1 = scalar_lea.vmem %s4299_s19, %s3013_s27  ;;  %s3744_s22 = scalar_lea.vmem %s4300_s3, %s3013_s27 }
  0x1d   : > { %s3753_s28 = scalar_lea.vmem %s4302_s5, %s3013_s27  ;;  %s3762_s2 = scalar_lea.vmem %s4303_s7, %s3013_s27 }
  0x1e   : > { %s3779_s29 = scalar_lea.vmem %s4305_s11, %s3013_s27  ;;  %s3018_s7 = sshll.u32 %s3729_s26, 7 }
  0x1f   : > { %s3789_s3 = scalar_lea.vmem %s4276_s13, %s3018_s7  ;;  %s770_s4 = scalar_lea.vmem %s4306_s17, %s3729_s26 }
  0x20   : > { %s4307_s11 = sld [smem:[#allocation13_spill]]  ;;  %777 = sbr.rel (%p2935_p4) target bundleno = 39 (0x27), region = 92  ;;  %v778_v0 = vld [vmem:[%s4308_s30] sm:$0xff] (!%p2935_p4)  ;;  %v779_v1 = vld [vmem:[%s4308_s30 + $0x8] sm:$0x7] (!%p2935_p4)  ;;  %v780_v2 = vld [vmem:[%s4308_s30 + $0x10] sm:$0xff] (!%p2935_p4) }
  0x21   : > { %783 = vst.msk [vmem:[%s4309_s23] sm:$0xff] (!%p2935_p4), %vm782_vm0, %v778_v0  ;;  %786 = vst.msk [vmem:[%s4309_s23 + $0x10] sm:$0xff] (!%p2935_p4), %vm782_vm0, %v780_v2  ;;  %v781_v3 = vld [vmem:[%s4308_s30 + $0x18] sm:$0x7] (!%p2935_p4) }
  0x22   : > { %785 = vst.msk [vmem:[%s4309_s23 + $0x8] sm:$0x7] (!%p2935_p4), %vm784_vm1, %v779_v1  ;;  %787 = vst.msk [vmem:[%s4309_s23 + $0x18] sm:$0x7] (!%p2935_p4), %vm784_vm1, %v781_v3 }
  0x26   : > { %s773_s10 = scalar_lea.vmem %s4307_s11, %s3729_s26 }
  0x27 PF: > { %v788_v4 = vld [vmem:[%s3739_s1] sm:$0xff]  ;;  %v789_v5 = vld [vmem:[%s3739_s1 + $0x8] sm:$0xff]  ;;  %vm883_vm2 = vcmask 261120   ;;  %v790_v9 = vld [vmem:[%s3739_s1 + $0x10] sm:$0xff]  ;;  %s4310_s24 = sld [smem:[#allocation14_spill]]  ;;  %v834_v26 = vlaneseq  ;;  %s4315_s16 = sld [smem:[#allocation5_spill]] }
  0x28   : > { %v793_v6 = vld [vmem:[%s3744_s22] sm:$0xff]  ;;  %v3395_v7 = vpack.c.bf16 %v789_v5, %v788_v4  ;;  %v794_v8 = vld [vmem:[%s3744_s22 + $0x8] sm:$0xff]  ;;  %v791_v10 = vld [vmem:[%s3739_s1 + $0x18] sm:$0xff]  ;;  %v3629_v36 = vmov 1.0|1.0   ;;  %s4317_s19 = sld [smem:[#allocation7_spill]]  ;;  %s4319_s5 = scalar_lea.vmem %s4269_s6, %s3729_s26 }
  0x29   : > { %v3411_v11 = vpack.c.bf16 %v794_v8, %v793_v6  ;;  %v3399_v12 = vpack.c.bf16 %v791_v10, %v790_v9  ;;  %v795_v13 = vld [vmem:[%s3744_s22 + $0x10] sm:$0xff]  ;;  %v796_v14 = vld [vmem:[%s3744_s22 + $0x18] sm:$0xff]  ;;  %v798_v18 = vld [vmem:[%s3753_s28] sm:$0xff]  ;;  %v3883_v27 = vand.u32 127, %v834_v26  ;;  %v3885_v28 = vshrl.u32 %v834_v26, 7  ;;  %s4320_s1 = scalar_lea.vmem %s4271_s8, %s3729_s26  ;;  %s4321_s23 = scalar_lea.vmem %s4272_s9, %s3729_s26 }
  0x2a   : > { %3396 = vmatprep.subr.bf16.mxu0 %v3395_v7  ;;  %v3415_v16 = vpack.c.bf16 %v796_v14, %v795_v13  ;;  %v799_v19 = vld [vmem:[%s3753_s28 + $0x8] sm:$0xff]  ;;  %v800_v22 = vld [vmem:[%s3753_s28 + $0x10] sm:$0xff]  ;;  %v801_v23 = vld [vmem:[%s3753_s28 + $0x18] sm:$0xff]  ;;  %s4322_s25 = sld [smem:[#allocation10_spill]]  ;;  %s4324_s18 = scalar_lea.vmem %s4275_s12, %s3729_s26 }
  0x2b   : > { %3398 = vmatpush3.bf16.msra.mxu0 %v3395_v7  ;;  %3420 = vmatprep.subr.bf16.mxu1 %v3411_v11  ;;  %v3427_v20 = vpack.c.bf16 %v799_v19, %v798_v18  ;;  %v3431_v25 = vpack.c.bf16 %v801_v23, %v800_v22  ;;  %v846_v29 = vadd.s32 1, %v3883_v27  ;;  %v836_v30 = vadd.s32 8, %v3885_v28  ;;  %v829_v35 = vld [vmem:[%s3789_s3 + $0x70] sm:$0xff] }
  0x2c   : > { %3422 = vmatpush3.bf16.msra.mxu1 %v3411_v11  ;;  %3400 = vmatprep.subr.bf16.mxu0 %v3399_v12  ;;  %v841_v31 = vmul.u32 8, %v3883_v27  ;;  %v837_v33 = vadd.s32 16, %v3885_v28  ;;  %v838_v34 = vadd.s32 24, %v3885_v28  ;;  %v864_v8 = vmul.u32 8, %v3885_v28 }
  0x2d   : > { %v3838_v15 = vld [vmem:[%s4310_s24] sm:$0xff]  ;;  %v3845_v17 = vld [vmem:[%s4310_s24 + $0x10] sm:$0xff]  ;;  %3424 = vmatprep.subr.bf16.mxu1 %v3415_v16  ;;  %v3854_v21 = vld [vmem:[%s4310_s24 + $0x8] sm:$0x7]  ;;  %v847_v32 = vmul.u32 8, %v846_v29  ;;  %s4316_s27 = scalar_lea.vmem %s4315_s16, %s3729_s26  ;;  %v866_v9 = vadd.s32 1, %v3885_v28 }
  0x2e   : > { %3159 = vmatprep.mubr.msk.f32.mxu0 %vm883_vm2, %v3838_v15  ;;  %3192 = vmatprep.mubr.msk.f32.mxu1 %vm883_vm2, %v3845_v17  ;;  %v3861_v24 = vld [vmem:[%s4310_s24 + $0x18] sm:$0x7]  ;;  %vm842_vm3 = vcmp.ge.s32.totalorder %v3885_v28, %v841_v31  ;;  %vm843_vm4 = vcmp.ge.s32.totalorder %v836_v30, %v841_v31  ;;  %vm844_vm10 = vcmp.ge.s32.totalorder %v837_v33, %v841_v31  ;;  %v2943_v38 = vld [vmem:[%s4316_s27] ss:$0 sm:$0xff]  ;;  %s4318_s7 = scalar_lea.vmem %s4317_s19, %s3729_s26 }
  0x2f   : > { %3402 = vmatpush3.bf16.msra.mxu0 %v3399_v12  ;;  %vm848_vm5 = vcmp.lt.s32.totalorder %v3885_v28, %v847_v32  ;;  %vm849_vm6 = vcmp.lt.s32.totalorder %v836_v30, %v847_v32  ;;  %vm845_vm11 = vcmp.ge.s32.totalorder %v838_v34, %v841_v31  ;;  %vm850_vm12 = vcmp.lt.s32.totalorder %v837_v33, %v847_v32  ;;  %v2948_v39 = vld [vmem:[%s4318_s7] ss:$0 sm:$0xff] }
  0x30   : > { %3426 = vmatpush3.bf16.msra.mxu1 %v3415_v16  ;;  %3404 = vmatprep.subr.bf16.mxu0 %v3395_v7  ;;  %vm852_vm7 = vmand %vm842_vm3, %vm848_vm5  ;;  %vm851_vm13 = vcmp.lt.s32.totalorder %v838_v34, %v847_v32  ;;  %vm865_vm1 = vcmp.ge.s32.totalorder %v3883_v27, %v864_v8  ;;  %v867_v10 = vmul.u32 8, %v866_v9  ;;  %s4323_s16 = scalar_lea.vmem %s4322_s25, %s3729_s26 }
  0x31   : > { %3436 = vmatprep.subr.bf16.mxu1 %v3427_v20  ;;  %vm853_vm8 = vmand %vm843_vm4, %vm849_vm6  ;;  %vm1555_vm4 = vcmask 1043456   ;;  %vm1548_vm6 = vcmask 31744  }
  0x32   : > { %3160 = vmatmul.mubr.msk.f32.vlgmr.msra.gmra.mrb[0].mxu0 %vm883_vm2, %v3854_v21  ;;  %vm3894_vm9 = vmpackc.low %vm853_vm8, %vm852_vm7  ;;  %vm868_vm3 = vcmp.lt.s32.totalorder %v3883_v27, %v867_v10  ;;  %vm1819_vm7 = vcmask 256000  }
  0x33   : > { %3406 = vmatpush3.bf16.msra.mxu0 %v3395_v7  ;;  %3193 = vmatmul.mubr.msk.f32.vlgmr.msra.gmra.mrb[0].mxu1 %vm883_vm2, %v3861_v24  ;;  %vm854_vm14 = vmand %vm844_vm10, %vm850_vm12 }
  0x34   : > { %3408 = vmatprep.subr.bf16.mxu0 %v3399_v12  ;;  %3170 = vmatprep.mubr.msk.f32.mxu0 %vm883_vm2, %v3845_v17  ;;  %vm855_vm15 = vmand %vm845_vm11, %vm851_vm13 }
  0x35   : > { %3438 = vmatpush3.bf16.msra.mxu1 %v3427_v20  ;;  %3214 = vmatprep.mubr.msk.f32.mxu1 %vm883_vm2, %v3845_v17  ;;  %vm3910_vm0 = vmpackc.low %vm855_vm15, %vm854_vm14 }
  0x36   : > { %3440 = vmatprep.subr.bf16.mxu1 %v3431_v25  ;;  %vm869_vm5 = vmand %vm865_vm1, %vm868_vm3 }
  0x37   : > { %3410 = vmatpush3.bf16.msra.mxu0 %v3399_v12 }
  0x38   : > { %3412 = vmatprep.subr.bf16.mxu0 %v3411_v11 }
  0x39   : > { %3442 = vmatpush3.bf16.msra.mxu1 %v3431_v25 }
  0x3a   : > { %3171 = vmatmul.mubr.msk.f32.vlgmr.msra.gmra.mrb[2].mxu0 %vm883_vm2, %v3861_v24  ;;  %3452 = vmatprep.subr.msk.bf16.mxu1 %vm3894_vm9, %v3629_v36 }
  0x3b   : > { %3414 = vmatpush3.bf16.msra.mxu0 %v3411_v11  ;;  %3181 = vmatprep.mubr.msk.f32.mxu0 %vm883_vm2, %v3838_v15  ;;  %v3630_v11 = vmov 0.0  }
  0x3c   : > { %3416 = vmatprep.subr.bf16.mxu0 %v3415_v16  ;;  %3215 = vmatmul.mubr.msk.f32.vlgmr.msra.gmra.mrb[2].mxu1 %vm883_vm2, %v3861_v24  ;;  %v3960_v12 = vsel %vm869_vm5, 1.0, %v3630_v11 }
  0x3d   : > { %3454 = vmatpush3.bf16.msk.msra.mxu1 %vm3894_vm9, %v3629_v36 }
  0x3e   : > { %3456 = vmatprep.subr.msk.bf16.mxu1 %vm3910_vm0, %v3629_v36 }
  0x3f   : > { %3418 = vmatpush3.bf16.msra.mxu0 %v3415_v16 }
  0x40   : > { %3428 = vmatprep.subr.bf16.mxu0 %v3427_v20 }
  0x41   : > { %3458 = vmatpush3.bf16.msk.msra.mxu1 %vm3910_vm0, %v3629_v36 }
  0x42   : > { %3182 = vmatmul.mubr.msk.f32.vlgmr.msra.gmra.mrb[4].mxu0 %vm883_vm2, %v3854_v21 }
  0x43   : > { %3430 = vmatpush3.bf16.msra.mxu0 %v3427_v20  ;;  %3203 = vmatprep.mubr.msk.f32.mxu0 %vm883_vm2, %v3838_v15 }
  0x44   : > { %3432 = vmatprep.subr.bf16.mxu0 %v3431_v25 }
  0x47   : > { %3434 = vmatpush3.bf16.msra.mxu0 %v3431_v25 }
  0x48   : > { %3444 = vmatprep.subr.msk.bf16.mxu0 %vm3894_vm9, %v3629_v36 }
  0x4a   : > { %3204 = vmatmul.mubr.msk.f32.vlgmr.msra.gmra.mrb[6].mxu0 %vm883_vm2, %v3854_v21 }
  0x4b   : > { %3446 = vmatpush3.bf16.msk.msra.mxu0 %vm3894_vm9, %v3629_v36 }
  0x4c   : > { %3448 = vmatprep.subr.msk.bf16.mxu0 %vm3910_vm0, %v3629_v36 }
  0x4f   : > { %3450 = vmatpush3.bf16.msk.msra.mxu0 %vm3910_vm0, %v3629_v36 }
  0x50   : > { %3239 = vmatprep.subr.msk.mxu0 %vm1555_vm4, %v3960_v12 }
 0x105   : > { %v3161_v40 = vpop.f32.mrb[0].mxu0 }
 0x106   : > { %v962_v41 = vadd.f32 %v3161_v40, %v2943_v38  ;;  %v956_v42 = vpop.f32.mrb[1].mxu0  ;;  %v3194_v43 = vpop.f32.mrb[0].mxu1 }
 0x107   : > { %v957_v44 = vadd.f32 %v2943_v38, %v956_v42  ;;  %v1203_v45 = vadd.f32 %v3194_v43, %v2948_v39  ;;  %v1197_v46 = vpop.f32.mrb[1].mxu1 }
 0x108   : > { %v966_v47 = vmul.f32 0.35355338, %v962_v41  ;;  %v1198_v48 = vadd.f32 %v2948_v39, %v1197_v46  ;;  %v803_v46 = vld [vmem:[%s3762_s2] sm:$0xff] }
 0x109   : > { %v965_v49 = vmul.f32 0.35355338, %v957_v44 }
 0x10a   : > { %v1446_v50 = vmul.f32 %v1203_v45, %v966_v47 }
 0x10b   : > { %v1445_v51 = vmul.f32 %v1198_v48, %v965_v49 }
 0x10d   : > { %v3172_v52 = vpop.f32.mrb[2].mxu0  ;;  %3236 = vmatprep.mubr.msk.f32.mxu1 %vm883_vm2, %v1445_v51 }
 0x10e   : > { %v1045_v53 = vadd.f32 %v3172_v52, %v2943_v38  ;;  %v1039_v54 = vpop.f32.mrb[3].mxu0  ;;  %3237 = vmatmul.mubr.msk.f32.vlgmr.msra.gmra.mrb[4].mxu1 %vm883_vm2, %v1446_v50  ;;  %v806_v50 = vld [vmem:[%s3762_s2 + $0x18] sm:$0xff]  ;;  %v2953_v52 = vld [vmem:[%s4319_s5] ss:$0 sm:$0xff] }
 0x10f   : > { %v1040_v55 = vadd.f32 %v2943_v38, %v1039_v54  ;;  %v3938_v56 = vpop.f32.mrb[2].mxu1 }
 0x110   : > { %v1049_v57 = vmul.f32 0.35355338, %v1045_v53  ;;  %v3940_v58 = vpop.f32.mrb[3].mxu1 }
 0x111   : > { %v1048_v59 = vmul.f32 0.35355338, %v1040_v55  ;;  %v3992_v55 = vadd.f32 %v3938_v56, %v2953_v52 }
 0x112   : > { %v3942_v60 = vmul.f32 %v1203_v45, %v1049_v57 }
 0x113   : > { %v3944_v61 = vmul.f32 %v1198_v48, %v1048_v59 }
 0x115   : > { %v3183_v62 = vpop.f32.mrb[4].mxu0 }
 0x116   : > { %v1128_v63 = vadd.f32 %v3183_v62, %v2948_v39  ;;  %v1122_v0 = vpop.f32.mrb[5].mxu0 }
 0x117   : > { %v1123_v1 = vadd.f32 %v2948_v39, %v1122_v0 }
 0x118   : > { %v1363_v2 = vmul.f32 %v1128_v63, %v966_v47  ;;  %v3946_v3 = vmul.f32 %v1128_v63, %v1049_v57  ;;  %v804_v47 = vld [vmem:[%s3762_s2 + $0x8] sm:$0xff] }
 0x119   : > { %v1362_v4 = vmul.f32 %v1123_v1, %v965_v49  ;;  %v3948_v5 = vmul.f32 %v1123_v1, %v1048_v59  ;;  %v3976_v48 = vpack.c.bf16 %v804_v47, %v803_v46  ;;  %v805_v49 = vld [vmem:[%s3762_s2 + $0x10] sm:$0xff]  ;;  %v3998_v59 = vadd.f32 %v2953_v52, %v3940_v58 }
 0x11a   : > { %v3982_v51 = vpack.c.bf16 %v806_v50, %v805_v49  ;;  %v821_v47 = vld [vmem:[%s3789_s3 + $0x30] sm:$0xff]  ;;  %v822_v49 = vld [vmem:[%s3789_s3 + $0x38] sm:$0xff] }
 0x11b   : > { %3225 = vmatprep.mubr.msk.f32.mxu0 %vm883_vm2, %v1362_v4  ;;  %v4066_v50 = vpack.c.bf16 %v822_v49, %v821_v47 }
 0x11c   : > { %3226 = vmatmul.mubr.msk.f32.vlgmr.msra.gmra.mrb[8].mxu0 %vm883_vm2, %v1363_v2 }
 0x11d   : > { %v3952_v6 = vpop.f32.mrb[6].mxu0  ;;  %3240 = vmatpush3.msk.msra.mxu0 %vm1555_vm4, %v3960_v12 }
 0x11e   : > { %v3954_v7 = vpop.f32.mrb[7].mxu0  ;;  %3244 = vmatprep.subr.msk.mxu0 %vm1555_vm4, %v3960_v12  ;;  %v3995_v57 = vadd.f32 %v3952_v6, %v2953_v52 }
 0x11f   : > { %v4001_v62 = vadd.f32 %v2953_v52, %v3954_v7  ;;  %v4014_v7 = vld [vmem:[%s4320_s1] ss:$0 sm:$0xff] }
 0x120   : > { %v823_v52 = vld [vmem:[%s3789_s3 + $0x40] sm:$0xff] }
 0x1e1   : > { %v3238_v13 = vpop.f32.mrb[4].mxu1 }
 0x1e2   : > { %v1519_v14 = vpop.f32.mrb[5].mxu1 }
 0x1ef   : > { %v3227_v16 = vpop.f32.mrb[8].mxu0 }
 0x1f0   : > { %v1529_v18 = vmax.f32 %v3227_v16, %v3238_v13  ;;  %v1436_v19 = vpop.f32.mrb[9].mxu0 }
 0x1f1   : > { %v1528_v20 = vmax.f32 %v1436_v19, %v1519_v14 }
 0x1f2   : > { %v1531_v22 = vsub.f32 %v3227_v16, %v1529_v18  ;;  %v1537_v23 = vsub.f32 %v3238_v13, %v1529_v18 }
 0x1f3   : > { %v1530_v25 = vsub.f32 %v1436_v19, %v1528_v20  ;;  %v1536_v26 = vsub.f32 %v1519_v14, %v1528_v20 }
 0x1f4   : > { %v1534_v27 = vmul.f32 1.442695, %v1531_v22  ;;  %v1540_v28 = vmul.f32 1.442695, %v1537_v23 }
 0x1f5   : > { %v1532_v29 = vmul.f32 1.442695, %v1530_v25  ;;  %v1538_v30 = vmul.f32 1.442695, %v1536_v26 }
 0x1f6   : > { %3581 = vpow2.f32 %v1534_v27 }
 0x1f7   : > { %3583 = vpow2.f32 %v1540_v28 }
 0x1f8   : > { %3585 = vpow2.f32 %v1532_v29  ;;  %v810_v29 = vld [vmem:[%s3779_s29] sm:$0xff] }
 0x1f9   : > { %3587 = vpow2.f32 %v1538_v30  ;;  %v811_v30 = vld [vmem:[%s3779_s29 + $0x8] sm:$0xff] }
 0x200   : > { %v3582_v31 = vpop.eup %3581 }
 0x201   : > { %v3584_v32 = vpop.eup %3583 }
 0x202   : > { %v3586_v33 = vpop.eup %3585  ;;  %v1543_v34 = vadd.f32 %v3584_v32, %v3582_v31 }
 0x203   : > { %v3588_v38 = vpop.eup %3587 }
 0x204   : > { %3589 = vrcp.f32 %v1543_v34  ;;  %v1542_v39 = vadd.f32 %v3588_v38, %v3586_v33 }
 0x206   : > { %3591 = vrcp.f32 %v1542_v39  ;;  %v816_v39 = vld [vmem:[%s3789_s3 + $0x8] sm:$0xff] }
 0x20e   : > { %v3590_v40 = vpop.eup %3589 }
 0x20f   : > { %v1547_v41 = vmul.f32 %v3590_v40, %v3582_v31  ;;  %v1639_v42 = vmul.f32 %v3590_v40, %v3584_v32  ;;  %v4034_v31 = vpack.c.bf16 %v811_v30, %v810_v29  ;;  %v812_v32 = vld [vmem:[%s3779_s29 + $0x10] sm:$0xff] }
 0x210   : > { %v3592_v43 = vpop.eup %3591  ;;  %v817_v40 = vld [vmem:[%s3789_s3 + $0x10] sm:$0xff] }
 0x211   : > { %v1546_v44 = vmul.f32 %v3592_v43, %v3586_v33  ;;  %v1638_v45 = vmul.f32 %v3592_v43, %v3588_v38  ;;  %3468 = vmatprep.subr.bf16.mxu1 %v4034_v31  ;;  %v813_v33 = vld [vmem:[%s3779_s29 + $0x18] sm:$0xff]  ;;  %v815_v38 = vld [vmem:[%s3789_s3] sm:$0xff] }
 0x212   : > { %3470 = vmatpush3.bf16.msra.mxu1 %v4034_v31  ;;  %v4040_v34 = vpack.c.bf16 %v813_v33, %v812_v32 }
 0x213   : > { %3241 = vmatprep.mubr.msk.f32.mxu0 %vm1548_vm6, %v1546_v44  ;;  %v819_v44 = vld [vmem:[%s3789_s3 + $0x20] sm:$0xff] }
 0x214   : > { %3242 = vmatmul.mubr.msk.f32.vlgmr.msra.gmra.mrb[10].mxu0 %vm1548_vm6, %v1547_v41  ;;  %3472 = vmatprep.subr.bf16.mxu1 %v4040_v34  ;;  %v4050_v41 = vpack.c.bf16 %v816_v39, %v815_v38 }
 0x215   : > { %3245 = vmatpush3.msk.msra.mxu0 %vm1555_vm4, %v3960_v12  ;;  %3246 = vmatprep.mubr.msk.f32.mxu0 %vm1548_vm6, %v1638_v45  ;;  %v820_v45 = vld [vmem:[%s3789_s3 + $0x28] sm:$0xff] }
 0x216   : > { %3460 = vmatprep.subr.bf16.mxu0 %v3976_v48  ;;  %3474 = vmatpush3.bf16.msra.mxu1 %v4040_v34  ;;  %v4060_v46 = vpack.c.bf16 %v820_v45, %v819_v44 }
 0x217   : > { %3508 = vmatprep.subr.msk.bf16.mxu1 %vm3894_vm9, %v3629_v36 }
 0x218   : > { %3247 = vmatmul.mubr.msk.f32.vlgmr.msra.gmra.mrb[12].mxu0 %vm1548_vm6, %v1639_v42  ;;  %v818_v42 = vld [vmem:[%s3789_s3 + $0x18] sm:$0xff] }
 0x219   : > { %3462 = vmatpush3.bf16.msra.mxu0 %v3976_v48  ;;  %v4053_v43 = vpack.c.bf16 %v818_v42, %v817_v40 }
 0x21a   : > { %3464 = vmatprep.subr.bf16.mxu0 %v3982_v51 }
 0x21d   : > { %3466 = vmatpush3.bf16.msra.mxu0 %v3982_v51 }
 0x21e   : > { %3476 = vmatprep.subr.bf16.mxu0 %v4050_v41 }
 0x2e7   : > { %v3243_v53 = vpop.f32.mrb[10].mxu0 }
 0x2e8   : > { %v1625_v54 = vpop.f32.mrb[11].mxu0  ;;  %v1635_v0 = vmul.f32 %v3243_v53, %v3995_v57  ;;  %v824_v53 = vld [vmem:[%s3789_s3 + $0x48] sm:$0xff] }
 0x2e9   : > { %v1634_v4 = vmul.f32 %v1625_v54, %v4001_v62  ;;  %v4072_v54 = vpack.c.bf16 %v824_v53, %v823_v52 }
 0x2eb   : > { %v3248_v63 = vpop.f32.mrb[12].mxu0 }
 0x2ec   : > { %v1722_v1 = vmul.f32 %v3248_v63, %v3992_v55  ;;  %v1712_v2 = vpop.f32.mrb[13].mxu0  ;;  %v825_v63 = vld [vmem:[%s3789_s3 + $0x50] sm:$0xff] }
 0x2ed   : > { %v1721_v56 = vmul.f32 %v1712_v2, %v3998_v59  ;;  %v827_v2 = vld [vmem:[%s3789_s3 + $0x60] sm:$0xff] }
 0x2ee   : > { %v1724_v8 = vadd.f32 %v1722_v1, %v1635_v0  ;;  %v826_v0 = vld [vmem:[%s3789_s3 + $0x58] sm:$0xff] }
 0x2ef   : > { %v1723_v9 = vadd.f32 %v1721_v56, %v1634_v4  ;;  %v4078_v1 = vpack.c.bf16 %v826_v0, %v825_v63  ;;  %v828_v4 = vld [vmem:[%s3789_s3 + $0x68] sm:$0xff] }
 0x2f0   : > { %v4084_v56 = vpack.c.bf16 %v828_v4, %v827_v2 }
 0x2f1   : > { %3257 = vmatprep.mubr.msk.f32.mxu0 %vm883_vm2, %v1723_v9 }
 0x2f2   : > { %3258 = vmatmul.mubr.msk.f32.vlgmr.msra.gmra.mrb[14].mxu0 %vm883_vm2, %v1724_v8 }
 0x2f3   : > { %3478 = vmatpush3.bf16.msra.mxu0 %v4050_v41 }
 0x2f4   : > { %3480 = vmatprep.subr.bf16.mxu0 %v4053_v43 }
 0x2f7   : > { %3482 = vmatpush3.bf16.msra.mxu0 %v4053_v43 }
 0x2f8   : > { %3484 = vmatprep.subr.bf16.mxu0 %v4060_v46 }
 0x2fb   : > { %3486 = vmatpush3.bf16.msra.mxu0 %v4060_v46 }
 0x2fc   : > { %3488 = vmatprep.subr.bf16.mxu0 %v4066_v50 }
 0x2ff   : > { %3490 = vmatpush3.bf16.msra.mxu0 %v4066_v50 }
 0x300   : > { %3492 = vmatprep.subr.bf16.mxu0 %v4072_v54 }
 0x303   : > { %3494 = vmatpush3.bf16.msra.mxu0 %v4072_v54 }
 0x304   : > { %3496 = vmatprep.subr.bf16.mxu0 %v4078_v1 }
 0x307   : > { %3498 = vmatpush3.bf16.msra.mxu0 %v4078_v1 }
 0x308   : > { %3500 = vmatprep.subr.bf16.mxu0 %v4084_v56 }
 0x30b   : > { %3502 = vmatpush3.bf16.msra.mxu0 %v4084_v56 }
 0x3c5   : > { %v3259_v58 = vpop.f32.mrb[14].mxu0 }
 0x3c6   : > { %v1797_v6 = vpop.f32.mrb[15].mxu0  ;;  %v1807_v10 = vadd.f32 %v3259_v58, %v3854_v21 }
 0x3c7   : > { %v1806_v11 = vadd.f32 %v1797_v6, %v3838_v15 }
 0x3c8   : > { %v1815_v16 = vadd.f32 %v4014_v7, %v1807_v10 }
 0x3c9   : > { %v1814_v13 = vadd.f32 %v4014_v7, %v1806_v11 }
 0x3ca   : > { %v1820_v18 = vsel %vm1819_vm7, %v1815_v16, 0.0 }
 0x3cb   : > { %v1816_v14 = vsel %vm883_vm2, %v1814_v13, 0.0 }
 0x3cc   : > { %1817 = vadd.xlane.f32.xlu0 %v1816_v14  ;;  %v4094_v14 = vld [vmem:[%s4321_s23] ss:$0 sm:$0xff] }
 0x3d0   : > { %1821 = vadd.xlane.f32.xlu0 %v1820_v18  ;;  %v4102_v18 = vld [vmem:[%s4323_s16] ss:$0 sm:$0xff] }
 0x459   : > { %v1818_v19 = vpop.xlane.xlu0 %1817 }
 0x45a   : > { %v1824_v20 = vmul.f32 0.03125, %v1818_v19 }
 0x45c   : > { %v4022_v22 = vsub.f32 %v1814_v13, %v1824_v20 }
 0x45d   : > { %v1822_v15 = vpop.xlane.xlu0 %1821 }
 0x45e   : > { %v1825_v21 = vmul.f32 0.03125, %v1822_v15  ;;  %v1828_v23 = vmul.f32 %v4022_v22, %v4022_v22 }
 0x460   : > { %v4026_v25 = vsub.f32 %v1815_v16, %v1825_v21  ;;  %v1830_v26 = vsel %vm883_vm2, %v1828_v23, 0.0 }
 0x461   : > { %1831 = vadd.xlane.f32.xlu1 %v1830_v26 }
 0x462   : > { %v1829_v27 = vmul.f32 %v4026_v25, %v4026_v25 }
 0x464   : > { %v1833_v28 = vsel %vm1819_vm7, %v1829_v27, 0.0 }
 0x465   : > { %1834 = vadd.xlane.f32.xlu1 %v1833_v28 }
 0x4ee   : > { %v1832_v8 = vpop.xlane.xlu1 %1831 }
 0x4ef   : > { %v1836_v9 = vmul.f32 0.03125, %v1832_v8 }
 0x4f1   : > { %v1838_v58 = vadd.f32 1e-05, %v1836_v9 }
 0x4f2   : > { %v1835_v6 = vpop.xlane.xlu1 %1834 }
 0x4f3   : > { %3593 = vrsqrt.f32 %v1838_v58  ;;  %v1837_v10 = vmul.f32 0.03125, %v1835_v6 }
 0x4f5   : > { %v1839_v11 = vadd.f32 1e-05, %v1837_v10 }
 0x4f7   : > { %3595 = vrsqrt.f32 %v1839_v11 }
 0x4fd   : > { %v3594_v13 = vpop.eup %3593 }
 0x4fe   : > { %v1842_v16 = vmul.f32 %v3594_v13, %v4022_v22 }
 0x500   : > { %v1850_v19 = vmul.f32 %v4094_v14, %v1842_v16 }
 0x501   : > { %v3596_v20 = vpop.eup %3595 }
 0x502   : > { %v1843_v15 = vmul.f32 %v3596_v20, %v4026_v25  ;;  %v4107_v21 = vadd.f32 %v4102_v18, %v1850_v19 }
 0x504   : > { %3268 = vmatprep.mubr.msk.f32.mxu1 %vm883_vm2, %v4107_v21  ;;  %v1851_v23 = vmul.f32 %v4094_v14, %v1843_v15 }
 0x506   : > { %v4113_v22 = vadd.f32 %v4102_v18, %v1851_v23 }
 0x508   : > { %3269 = vmatmul.mubr.msk.f32.vlgmr.msra.gmra.mrb[6].mxu1 %vm883_vm2, %v4113_v22 }
 0x509   : > { %3510 = vmatpush3.bf16.msk.msra.mxu1 %vm3894_vm9, %v3629_v36  ;;  %3314 = vmatprep.mubr.msk.f32.mxu1 %vm883_vm2, %v3948_v5 }
 0x50a   : > { %3512 = vmatprep.subr.msk.bf16.mxu1 %vm3910_vm0, %v3629_v36 }
 0x50d   : > { %3514 = vmatpush3.bf16.msk.msra.mxu1 %vm3910_vm0, %v3629_v36 }
 0x50e   : > { %3516 = vmatprep.subr.msk.bf16.mxu1 %vm3894_vm9, %v3629_v36 }
 0x510   : > { %3315 = vmatmul.mubr.msk.f32.vlgmr.msra.gmra.mrb[8].mxu1 %vm883_vm2, %v3946_v3 }
 0x511   : > { %3518 = vmatpush3.bf16.msk.msra.mxu1 %vm3894_vm9, %v3629_v36  ;;  %3325 = vmatprep.mubr.msk.f32.mxu1 %vm883_vm2, %v3944_v61  ;;  %v830_v61 = vld [vmem:[%s3789_s3 + $0x78] sm:$0xff] }
 0x512   : > { %3520 = vmatprep.subr.msk.bf16.mxu1 %vm3910_vm0, %v3629_v36  ;;  %v4154_v3 = vpack.c.bf16 %v830_v61, %v829_v35 }
 0x514   : > { %3504 = vmatprep.subr.bf16.mxu0 %v4154_v3 }
 0x515   : > { %3522 = vmatpush3.bf16.msk.msra.mxu1 %vm3910_vm0, %v3629_v36  ;;  %3506 = vmatpush3.bf16.msra.mxu0 %v4154_v3  ;;  %v4164_v36 = vld [vmem:[%s4324_s18] ss:$0 sm:$0xff] }
 0x516   : > { %3328 = vmatprep.subr.msk.mxu1 %vm1555_vm4, %v3960_v12  ;;  %3532 = vmatprep.subr.bf16.mxu0 %v4034_v31 }
 0x518   : > { %3326 = vmatmul.mubr.msk.f32.vlgmr.msra.gmra.mrb[10].mxu1 %vm883_vm2, %v3942_v60 }
 0x519   : > { %3329 = vmatpush3.msk.msra.mxu1 %vm1555_vm4, %v3960_v12 }
 0x51a   : > { %3333 = vmatprep.subr.msk.mxu1 %vm1555_vm4, %v3960_v12 }
 0x5db   : > { %v3270_v37 = vpop.f32.mrb[6].mxu1 }
 0x5dc   : > { %v1944_v60 = vadd.f32 %v3270_v37, %v4164_v36  ;;  %v1938_v5 = vpop.f32.mrb[7].mxu1 }
 0x5dd   : > { %v1939_v25 = vadd.f32 %v4164_v36, %v1938_v5 }
 0x5de   : > { %v1948_v27 = vmax.f32 %v1944_v60, 0.0 }
 0x5df   : > { %v1947_v26 = vmax.f32 %v1939_v25, 0.0 }
 0x5e1   : > { %3303 = vmatprep.mubr.f32.mxu0 %v1947_v26 }
 0x5e2   : > { %3304 = vmatmul.mubr.f32.vlgmr.msra.gmra.mrb[16].mxu0 %v1948_v27 }
 0x5e3   : > { %v3316_v28 = vpop.f32.mrb[8].mxu1  ;;  %3534 = vmatpush3.bf16.msra.mxu0 %v4034_v31 }
 0x5e4   : > { %v2150_v29 = vpop.f32.mrb[9].mxu1  ;;  %3536 = vmatprep.subr.bf16.mxu0 %v4040_v34 }
 0x5e7   : > { %3538 = vmatpush3.bf16.msra.mxu0 %v4040_v34 }
 0x5eb   : > { %v3327_v30 = vpop.f32.mrb[10].mxu1 }
 0x5ec   : > { %v2243_v32 = vmax.f32 %v3316_v28, %v3327_v30  ;;  %v2233_v33 = vpop.f32.mrb[11].mxu1 }
 0x5ed   : > { %v2242_v38 = vmax.f32 %v2150_v29, %v2233_v33 }
 0x5ee   : > { %v2245_v39 = vsub.f32 %v3316_v28, %v2243_v32  ;;  %v2251_v40 = vsub.f32 %v3327_v30, %v2243_v32 }
 0x5ef   : > { %v2244_v42 = vsub.f32 %v2150_v29, %v2242_v38  ;;  %v2250_v44 = vsub.f32 %v2233_v33, %v2242_v38 }
 0x5f0   : > { %v2248_v45 = vmul.f32 1.442695, %v2245_v39  ;;  %v2254_v47 = vmul.f32 1.442695, %v2251_v40 }
 0x5f1   : > { %v2246_v49 = vmul.f32 1.442695, %v2244_v42  ;;  %v2252_v52 = vmul.f32 1.442695, %v2250_v44 }
 0x5f2   : > { %3597 = vpow2.f32 %v2248_v45 }
 0x5f3   : > { %3599 = vpow2.f32 %v2254_v47 }
 0x5f4   : > { %3601 = vpow2.f32 %v2246_v49 }
 0x5f5   : > { %3603 = vpow2.f32 %v2252_v52 }
 0x5fc   : > { %v3598_v31 = vpop.eup %3597 }
 0x5fd   : > { %v3600_v53 = vpop.eup %3599 }
 0x5fe   : > { %v3602_v63 = vpop.eup %3601  ;;  %v2257_v34 = vadd.f32 %v3600_v53, %v3598_v31 }
 0x5ff   : > { %v3604_v0 = vpop.eup %3603 }
 0x600   : > { %3605 = vrcp.f32 %v2257_v34  ;;  %v2256_v2 = vadd.f32 %v3604_v0, %v3602_v63 }
 0x602   : > { %3607 = vrcp.f32 %v2256_v2 }
 0x60a   : > { %v3606_v4 = vpop.eup %3605 }
 0x60b   : > { %v2261_v8 = vmul.f32 %v3606_v4, %v3598_v31  ;;  %v2348_v9 = vmul.f32 %v3606_v4, %v3600_v53 }
 0x60c   : > { %v3608_v58 = vpop.eup %3607 }
 0x60d   : > { %v2260_v6 = vmul.f32 %v3608_v58, %v3602_v63  ;;  %v2347_v10 = vmul.f32 %v3608_v58, %v3604_v0 }
 0x60f   : > { %3330 = vmatprep.mubr.msk.f32.mxu1 %vm1548_vm6, %v2260_v6 }
 0x610   : > { %3331 = vmatmul.mubr.msk.f32.vlgmr.msra.gmra.mrb[12].mxu1 %vm1548_vm6, %v2261_v8 }
 0x611   : > { %3334 = vmatpush3.msk.msra.mxu1 %vm1555_vm4, %v3960_v12  ;;  %3335 = vmatprep.mubr.msk.f32.mxu1 %vm1548_vm6, %v2347_v10 }
 0x612   : > { %3524 = vmatprep.subr.bf16.mxu1 %v3976_v48 }
 0x614   : > { %3336 = vmatmul.mubr.msk.f32.vlgmr.msra.gmra.mrb[14].mxu1 %vm1548_vm6, %v2348_v9 }
 0x615   : > { %3526 = vmatpush3.bf16.msra.mxu1 %v3976_v48 }
 0x616   : > { %3528 = vmatprep.subr.bf16.mxu1 %v3982_v51 }
 0x619   : > { %3530 = vmatpush3.bf16.msra.mxu1 %v3982_v51 }
 0x61a   : > { %3540 = vmatprep.subr.bf16.mxu1 %v4050_v41 }
 0x6b5   : > { %v3305_v11 = vpop.f32.mrb[16].mxu0 }
 0x6b6   : > { %v2021_v13 = vpop.f32.mrb[17].mxu0 }
 0x6e3   : > { %v3332_v16 = vpop.f32.mrb[12].mxu1 }
 0x6e4   : > { %v2334_v19 = vpop.f32.mrb[13].mxu1  ;;  %v2344_v12 = vmul.f32 %v3332_v16, %v3995_v57 }
 0x6e5   : > { %v2343_v35 = vmul.f32 %v2334_v19, %v4001_v62 }
 0x6e7   : > { %v3337_v20 = vpop.f32.mrb[14].mxu1 }
 0x6e8   : > { %v2431_v15 = vmul.f32 %v3337_v20, %v3992_v55  ;;  %v2421_v23 = vpop.f32.mrb[15].mxu1 }
 0x6e9   : > { %v2430_v48 = vmul.f32 %v2421_v23, %v3998_v59 }
 0x6ea   : > { %v2433_v61 = vadd.f32 %v2431_v15, %v2344_v12 }
 0x6eb   : > { %v2432_v37 = vadd.f32 %v2430_v48, %v2343_v35 }
 0x6ed   : > { %3346 = vmatprep.mubr.msk.f32.mxu1 %vm883_vm2, %v2432_v37 }
 0x6ee   : > { %3347 = vmatmul.mubr.msk.f32.vlgmr.msra.gmra.mrb[16].mxu1 %vm883_vm2, %v2433_v61 }
 0x6ef   : > { %3542 = vmatpush3.bf16.msra.mxu1 %v4050_v41 }
 0x6f0   : > { %3544 = vmatprep.subr.bf16.mxu1 %v4053_v43 }
 0x6f3   : > { %3546 = vmatpush3.bf16.msra.mxu1 %v4053_v43 }
 0x6f4   : > { %3548 = vmatprep.subr.bf16.mxu1 %v4060_v46 }
 0x6f7   : > { %3550 = vmatpush3.bf16.msra.mxu1 %v4060_v46 }
 0x6f8   : > { %3552 = vmatprep.subr.bf16.mxu1 %v4066_v50 }
 0x6fb   : > { %3554 = vmatpush3.bf16.msra.mxu1 %v4066_v50  ;;  %v2984_v50 = vld [vmem:[%s767_s15] ss:$0 sm:$0xff] }
 0x6fc   : > { %3556 = vmatprep.subr.bf16.mxu1 %v4072_v54  ;;  %v2022_v60 = vadd.f32 %v2984_v50, %v2021_v13 }
 0x6fe   : > { %v2030_v29 = vadd.f32 %v2022_v60, %v4107_v21 }
 0x6ff   : > { %3558 = vmatpush3.bf16.msra.mxu1 %v4072_v54 }
 0x700   : > { %3560 = vmatprep.subr.bf16.mxu1 %v4078_v1  ;;  %v2032_v32 = vsel %vm883_vm2, %v2030_v29, 0.0 }
 0x703   : > { %3562 = vmatpush3.bf16.msra.mxu1 %v4078_v1 }
 0x704   : > { %3564 = vmatprep.subr.bf16.mxu1 %v4084_v56 }
 0x707   : > { %3566 = vmatpush3.bf16.msra.mxu1 %v4084_v56 }
 0x708   : > { %3568 = vmatprep.subr.bf16.mxu1 %v4154_v3 }
 0x70b   : > { %3570 = vmatpush3.bf16.msra.mxu1 %v4154_v3 }
 0x7c1   : > { %v3348_v51 = vpop.f32.mrb[16].mxu1 }
 0x7c2   : > { %v2516_v55 = vadd.f32 %v3348_v51, %v3861_v24  ;;  %v2506_v57 = vpop.f32.mrb[17].mxu1 }
 0x7c3   : > { %v2515_v59 = vadd.f32 %v3845_v17, %v2506_v57  ;;  %v2027_v17 = vadd.f32 %v3305_v11, %v2984_v50 }
 0x7c4   : > { %v2518_v62 = vadd.f32 %v4014_v7, %v2516_v55 }
 0x7c5   : > { %v2517_v41 = vadd.f32 %v4014_v7, %v2515_v59  ;;  %v2031_v27 = vadd.f32 %v2027_v17, %v4113_v22 }
 0x7c6   : > { %v2522_v43 = vsel %vm1819_vm7, %v2518_v62, 0.0 }
 0x7c7   : > { %2523 = vadd.xlane.f32.xlu1 %v2522_v43  ;;  %v2519_v46 = vsel %vm883_vm2, %v2517_v41, 0.0  ;;  %v2035_v30 = vsel %vm1819_vm7, %v2031_v27, 0.0 }
 0x7c8   : > { %2520 = vadd.xlane.f32.xlu0 %v2519_v46 }
 0x854   : > { %v2524_v54 = vpop.xlane.xlu1 %2523 }
 0x855   : > { %v2526_v24 = vmul.f32 0.03125, %v2524_v54  ;;  %v2521_v1 = vpop.xlane.xlu0 %2520 }
 0x856   : > { %v2525_v56 = vmul.f32 0.03125, %v2521_v1 }
 0x857   : > { %v2528_v3 = vsub.f32 %v2518_v62, %v2526_v24 }
 0x858   : > { %v2527_v5 = vsub.f32 %v2517_v41, %v2525_v56 }
 0x859   : > { %v2530_v7 = vmul.f32 %v2528_v3, %v2528_v3 }
 0x85a   : > { %v2529_v25 = vmul.f32 %v2527_v5, %v2527_v5 }
 0x85b   : > { %v2534_v26 = vsel %vm1819_vm7, %v2530_v7, 0.0 }
 0x85c   : > { %2535 = vadd.xlane.f32.xlu1 %v2534_v26  ;;  %v2531_v28 = vsel %vm883_vm2, %v2529_v25, 0.0  ;;  %v2986_v26 = vld [vmem:[%s773_s10] ss:$0 sm:$0xff] }
 0x85d   : > { %2532 = vadd.xlane.f32.xlu0 %v2531_v28 }
 0x860   : > { %2036 = vadd.xlane.f32.xlu1 %v2035_v30 }
 0x861   : > { %2033 = vadd.xlane.f32.xlu0 %v2032_v32 }
 0x8e9   : > { %v2536_v33 = vpop.xlane.xlu1 %2535 }
 0x8ea   : > { %v2538_v38 = vmul.f32 0.03125, %v2536_v33  ;;  %v2533_v39 = vpop.xlane.xlu0 %2532 }
 0x8eb   : > { %v2537_v40 = vmul.f32 0.03125, %v2533_v39 }
 0x8ec   : > { %v2540_v42 = vadd.f32 1e-05, %v2538_v38 }
 0x8ed   : > { %v2539_v44 = vadd.f32 1e-05, %v2537_v40  ;;  %v2037_v9 = vpop.xlane.xlu1 %2036 }
 0x8ee   : > { %3609 = vrsqrt.f32 %v2540_v42  ;;  %v2039_v58 = vmul.f32 0.03125, %v2037_v9 }
 0x8ef   : > { %3611 = vrsqrt.f32 %v2539_v44 }
 0x8f8   : > { %v3610_v22 = vpop.eup %3609 }
 0x8f9   : > { %v3612_v45 = vpop.eup %3611  ;;  %v2544_v47 = vmul.f32 %v3610_v22, %v2528_v3 }
 0x8fa   : > { %v2543_v49 = vmul.f32 %v3612_v45, %v2527_v5  ;;  %v2985_v5 = vld [vmem:[%s770_s4] ss:$0 sm:$0xff] }
 0x8fb   : > { %v2546_v21 = vmul.f32 %v4094_v14, %v2544_v47 }
 0x8fc   : > { %v2545_v52 = vmul.f32 %v4094_v14, %v2543_v49  ;;  %v2034_v14 = vpop.xlane.xlu0 %2033 }
 0x8fd   : > { %v2548_v53 = vadd.f32 %v4102_v18, %v2546_v21  ;;  %v2038_v6 = vmul.f32 0.03125, %v2034_v14 }
 0x8fe   : > { %v2547_v31 = vadd.f32 %v4102_v18, %v2545_v52  ;;  %v2041_v18 = vsub.f32 %v2031_v27, %v2039_v58 }
 0x8ff   : > { %v2040_v16 = vsub.f32 %v2030_v29, %v2038_v6 }
 0x900   : > { %3357 = vmatprep.mubr.msk.f32.mxu0 %vm883_vm2, %v2547_v31  ;;  %v2043_v23 = vmul.f32 %v2041_v18, %v2041_v18 }
 0x901   : > { %3358 = vmatmul.mubr.msk.f32.vlgmr.msra.gmra.mrb[18].mxu0 %vm883_vm2, %v2548_v53  ;;  %v2042_v35 = vmul.f32 %v2040_v16, %v2040_v16 }
 0x902   : > { %v2047_v48 = vsel %vm1819_vm7, %v2043_v23, 0.0 }
 0x903   : > { %v2044_v61 = vsel %vm883_vm2, %v2042_v35, 0.0 }
 0x9d4   : > { %v3359_v63 = vpop.f32.mrb[18].mxu0 }
 0x9d5   : > { %v2627_v34 = vadd.f32 %v3359_v63, %v4164_v36  ;;  %v2621_v0 = vpop.f32.mrb[19].mxu0 }
 0x9d6   : > { %v2622_v2 = vadd.f32 %v4164_v36, %v2621_v0 }
 0x9d7   : > { %v2631_v8 = vmax.f32 %v2627_v34, 0.0 }
 0x9d8   : > { %v2630_v4 = vmax.f32 %v2622_v2, 0.0 }
 0x9da   : > { %3392 = vmatprep.mubr.f32.mxu1 %v2630_v4 }
 0x9db   : > { %3393 = vmatmul.mubr.f32.vlgmr.msra.gmra.mrb[18].mxu1 %v2631_v8 }
 0xaae   : > { %v3394_v10 = vpop.f32.mrb[18].mxu1 }
 0xaaf   : > { %v2704_v11 = vadd.f32 %v3394_v10, %v2984_v50  ;;  %v2698_v13 = vpop.f32.mrb[19].mxu1 }
 0xab0   : > { %v2699_v19 = vadd.f32 %v2984_v50, %v2698_v13 }
 0xab1   : > { %v2708_v20 = vadd.f32 %v2704_v11, %v2548_v53 }
 0xab2   : > { %v2707_v12 = vadd.f32 %v2699_v19, %v2547_v31 }
 0xab3   : > { %v2712_v15 = vsel %vm1819_vm7, %v2708_v20, 0.0 }
 0xab4   : > { %2713 = vadd.xlane.f32.xlu1 %v2712_v15  ;;  %v2709_v36 = vsel %vm883_vm2, %v2707_v12, 0.0 }
 0xab5   : > { %2710 = vadd.xlane.f32.xlu0 %v2709_v36 }
 0xab8   : > { %2048 = vadd.xlane.f32.xlu1 %v2047_v48 }
 0xab9   : > { %2045 = vadd.xlane.f32.xlu0 %v2044_v61 }
 0xb41   : > { %v2714_v37 = vpop.xlane.xlu1 %2713 }
 0xb42   : > { %v2716_v51 = vmul.f32 0.03125, %v2714_v37  ;;  %v2711_v55 = vpop.xlane.xlu0 %2710 }
 0xb43   : > { %v2715_v57 = vmul.f32 0.03125, %v2711_v55 }
 0xb44   : > { %v2718_v59 = vsub.f32 %v2708_v20, %v2716_v51 }
 0xb45   : > { %v2717_v62 = vsub.f32 %v2707_v12, %v2715_v57  ;;  %v2049_v41 = vpop.xlane.xlu1 %2048 }
 0xb46   : > { %v2051_v43 = vmul.f32 0.03125, %v2049_v41  ;;  %v2046_v46 = vpop.xlane.xlu0 %2045  ;;  %v2720_v50 = vmul.f32 %v2718_v59, %v2718_v59 }
 0xb47   : > { %v2050_v54 = vmul.f32 0.03125, %v2046_v46  ;;  %v2719_v24 = vmul.f32 %v2717_v62, %v2717_v62 }
 0xb48   : > { %v2053_v1 = vadd.f32 1e-05, %v2051_v43  ;;  %v2724_v56 = vsel %vm1819_vm7, %v2720_v50, 0.0 }
 0xb49   : > { %v2052_v17 = vadd.f32 1e-05, %v2050_v54  ;;  %2725 = vadd.xlane.f32.xlu1 %v2724_v56  ;;  %v2721_v3 = vsel %vm883_vm2, %v2719_v24, 0.0 }
 0xb4a   : > { %3613 = vrsqrt.f32 %v2053_v1  ;;  %2722 = vadd.xlane.f32.xlu0 %v2721_v3 }
 0xb4b   : > { %3615 = vrsqrt.f32 %v2052_v17 }
 0xb54   : > { %v3614_v60 = vpop.eup %3613 }
 0xb55   : > { %v3616_v7 = vpop.eup %3615  ;;  %v2057_v25 = vmul.f32 %v3614_v60, %v2041_v18 }
 0xb56   : > { %v2056_v27 = vmul.f32 %v3616_v7, %v2040_v16 }
 0xb57   : > { %v2065_v28 = vmul.f32 %v2985_v5, %v2057_v25 }
 0xb58   : > { %v2064_v29 = vmul.f32 %v2985_v5, %v2056_v27 }
 0xb59   : > { %v2073_v30 = vadd.f32 %v2986_v26, %v2065_v28 }
 0xb5a   : > { %v2072_v32 = vadd.f32 %v2986_v26, %v2064_v29 }
 0xb5b   : > { %2075 = vst.msk [vmem:[%s4310_s24 + $0x8] sm:$0x7] %vm1819_vm7, %v2073_v30 }
 0xb5c   : > { %2074 = vst.msk [vmem:[%s4310_s24] sm:$0xff] %vm883_vm2, %v2072_v32 }
 0xbd6   : > { %v2726_v33 = vpop.xlane.xlu1 %2725 }
 0xbd7   : > { %v2728_v38 = vmul.f32 0.03125, %v2726_v33  ;;  %v2723_v39 = vpop.xlane.xlu0 %2722 }
 0xbd8   : > { %v2727_v40 = vmul.f32 0.03125, %v2723_v39 }
 0xbd9   : > { %v2730_v42 = vadd.f32 1e-05, %v2728_v38 }
 0xbda   : > { %v2729_v44 = vadd.f32 1e-05, %v2727_v40 }
 0xbdb   : > { %3617 = vrsqrt.f32 %v2730_v42 }
 0xbdc   : > { %3619 = vrsqrt.f32 %v2729_v44 }
 0xbe5   : > { %v3618_v22 = vpop.eup %3617 }
 0xbe6   : > { %v3620_v45 = vpop.eup %3619  ;;  %v2734_v47 = vmul.f32 %v3618_v22, %v2718_v59 }
 0xbe7   : > { %v2733_v49 = vmul.f32 %v3620_v45, %v2717_v62 }
 0xbe8   : > { %v2736_v21 = vmul.f32 %v2985_v5, %v2734_v47 }
 0xbe9   : > { %v2735_v52 = vmul.f32 %v2985_v5, %v2733_v49 }
 0xbea   : > { %v2738_v31 = vadd.f32 %v2986_v26, %v2736_v21 }
 0xbeb   : > { %v2737_v53 = vadd.f32 %v2986_v26, %v2735_v52 }
 0xbec   : > { %3010 = vst.msk [vmem:[%s4310_s24 + $0x18] sm:$0x7] %vm1819_vm7, %v2738_v31 }
 0xbed   : > { %3009 = vst.msk [vmem:[%s4310_s24 + $0x10] sm:$0xff] %vm883_vm2, %v2737_v53 }
 0xbee PF: > { %s4327_s11 = sld [smem:[#allocation2_spill]] }
 0xbf4   : > { %s27_s24 = sadd.s32 1, %s4327_s11  }
 0xbf5   : > { %p24_p5 = scmp.ge.s32.totalorder %s27_s24, 4  }
 0xbf7   :  { %26 = sbr.rel (!%p24_p5) target bundleno = 13 (0xd), region = 164 }

</bundles_post_ra>
